<compile_context>
chip_gen: v7x
topology: tpu7x:2x2x1
jax: 0.10.0
libtpu: 0.0.40
codegen_flags: <defaults>
</compile_context>

<pallas_src>
import functools
import math

import jax
import jax.numpy as jnp
from jax.experimental import pallas as pl
from jax.experimental.pallas import tpu as pltpu

_HIGHEST = jax.lax.Precision.HIGHEST


def _siren_kernel(x_ref, *rest, meta):
    """One grid step = one batch element; whole layer stack, VMEM-resident.

    x_ref:  (1, C0, L)   coords in grouped-conv layout for this batch
    rest:   per layer: scale*W0 ref (C_out, C_in), style-scale ref (1, 1, C_in)
            followed by out_ref (1, C_out_f, L)
    """
    out_ref = rest[-1]
    layer_refs = rest[:-1]

    x = x_ref[0]                                        # (C, L) f32

    for i, (omega, apply_sin, cin, cout) in enumerate(meta):
        w0s = layer_refs[2 * i][...]                    # (C_out, C_in) scale*W0
        s_row = layer_refs[2 * i + 1][0]                # (1, C_in) per-batch style scale

        # Modulated weight + demod, all at per-batch width (no B*L redundancy).
        w_s = w0s * s_row                               # (C_out, C_in)  VPU
        demod = jax.lax.rsqrt(
            jnp.sum(w_s * w_s, axis=1, keepdims=True) + 1e-8)   # (C_out, 1) XLU+EUP
        w_eff = w_s * demod                             # (C_out, C_in)  VPU

        if cin <= 4:
            # Tiny-K contraction (first layer, C_in=2): VPU outer products,
            # skip the nearly-all-padding MXU pass.
            y = w_eff[:, 0:1] * x[0:1, :]
            for c in range(1, cin):
                y = y + w_eff[:, c:c + 1] * x[c:c + 1, :]
        elif apply_sin:
            # sin(30*x) amplifies matmul rounding -> keep full f32 accuracy.
            y = jnp.dot(w_eff, x, precision=_HIGHEST,
                        preferred_element_type=jnp.float32)
        else:
            # Final linear layer: no sin amplification -> single-pass bf16 MXU
            # matmul with f32 accumulation (perf-review precision cut).
            y = jnp.dot(w_eff.astype(jnp.bfloat16), x.astype(jnp.bfloat16),
                        preferred_element_type=jnp.float32)

        if apply_sin:
            y = jnp.sin(omega * y)
        x = y

    out_ref[0] = x.astype(out_ref.dtype)


@functools.partial(jax.jit, static_argnums=0)
def _siren_forward_jit(meta, coords, style, weights):
    B, L, c0 = coords.shape
    c_f = meta[-1][3]

    # PyTorch: input.reshape(1, B*C_in, L) is a raw row-major reinterpretation
    # (NOT a transpose); the inter-layer view/reshape pairs cancel, so the
    # grouped-conv layout (B, C, L) is the stable one.
    x_conv = jnp.reshape(coords, (B, c0, L))

    kernel_inputs = [x_conv]
    in_specs = [pl.BlockSpec((1, c0, L), lambda b: (b, 0, 0))]
    for (omega, apply_sin, cin, cout), (w0s, wmod) in zip(meta, weights):
        # Per-batch style scale (hoisted out of the kernel / out of the L axis).
        s = jnp.matmul(style, wmod.T, precision=_HIGHEST)        # (B, C_in)
        kernel_inputs.append(w0s)
        in_specs.append(pl.BlockSpec((cout, cin), lambda b: (0, 0)))   # resident
        kernel_inputs.append(jnp.reshape(s, (B, 1, cin)))
        in_specs.append(pl.BlockSpec((1, 1, cin), lambda b: (b, 0, 0)))

    kernel = functools.partial(_siren_kernel, meta=meta)
    out_conv = pl.pallas_call(
        kernel,
        out_shape=jax.ShapeDtypeStruct((B, c_f, L), coords.dtype),
        grid=(B,),
        in_specs=in_specs,
        out_specs=pl.BlockSpec((1, c_f, L), lambda b: (b, 0, 0)),
        compiler_params=pltpu.CompilerParams(
            dimension_semantics=("parallel",)),
    )(*kernel_inputs)

    # PyTorch's out.view(B, L, C_out) raw reinterpretation.
    return jnp.reshape(out_conv, (B, L, c_f))


def siren_forward(coords, style, params):
    """coords: (B, L, C0), style: (B, S) -> (B, L, C_out_final)."""
    meta = tuple((float(p["omega"]), bool(p["apply_sin"]),
                  int(p["w0_scaled"].shape[1]), int(p["w0_scaled"].shape[0]))
                 for p in params)
    weights = tuple((p["w0_scaled"], p["wmod_scaled"]) for p in params)
    return _siren_forward_jit(meta, coords, style, weights)


def init_siren_params(key, in_features, hidden_size, hidden_layers,
                      out_features, style_size,
                      first_omega_0=30.0, hidden_omega_0=30.0):
    """Synthetic params matching the PyTorch __init__ shapes/inits, with the
    constant scales folded once at prep time."""
    cfgs = [dict(cin=in_features, cout=hidden_size, is_first=True,
                 omega=first_omega_0, apply_sin=True)]
    for _ in range(hidden_layers):
        cfgs.append(dict(cin=hidden_size, cout=hidden_size, is_first=False,
                         omega=hidden_omega_0, apply_sin=True))
    # outermost_linear=True: plain ModulatedLinear with the SIREN final init.
    cfgs.append(dict(cin=hidden_size, cout=out_features, is_first=False,
                     omega=hidden_omega_0, apply_sin=False))

    params = []
    for cfg in cfgs:
        key, k_w, k_m = jax.random.split(key, 3)
        cin, cout = cfg["cin"], cfg["cout"]
        bound = 1.0 / cin if cfg["is_first"] else math.sqrt(6.0 / cin) / cfg["omega"]
        # ModulatedLinear.weight is (1, C_out, C_in, 1) -> stored squeezed.
        w0 = jax.random.uniform(k_w, (cout, cin), jnp.float32, -bound, bound)
        scale = 1.0 / math.sqrt(cin)                        # ModulatedLinear.scale
        if style_size != cin:
            # modulation FullyConnectedLayer: weight ~ randn(C_in, S), gain 1/sqrt(S)
            wmod = jax.random.normal(k_m, (cin, style_size), jnp.float32)
            mod_scale = 1.0 / math.sqrt(style_size)
        else:
            # ModulatedLinear skips the FC when style_size == in_channels.
            wmod = jnp.eye(cin, dtype=jnp.float32)
            mod_scale = 1.0
        params.append(dict(
            w0=w0, wmod=wmod, scale=scale, mod_scale=mod_scale,
            w0_scaled=(scale * w0).astype(jnp.float32),
            wmod_scaled=(wmod * mod_scale).astype(jnp.float32),
            omega=float(cfg["omega"]),
            apply_sin=cfg["apply_sin"]))
    return params


def siren_reference(coords, style, params):
    """Pure-JAX mirror of the PyTorch ops (raw reshapes included), f32-accurate."""
    x = coords
    for p in params:
        b, length, _ = x.shape
        cout, cin = p["w0"].shape
        s_mod = jnp.matmul(style, (p["wmod"] * p["mod_scale"]).T, precision=_HIGHEST)
        w = p["scale"] * p["w0"][None] * s_mod[:, None, :]        # (B, C_out, C_in)
        d = jax.lax.rsqrt(jnp.sum(w * w, axis=2, keepdims=True) + 1e-8)
        w = w * d
        x_r = jnp.reshape(x, (b, cin, length))                    # reshape(1, B*C_in, L)
        y = jnp.einsum("boc,bcl->bol", w, x_r, precision=_HIGHEST)
        if p["apply_sin"]:
            y = jnp.sin(p["omega"] * y)
        x = jnp.reshape(y, (b, length, cout))                     # out.view(B, L, C_out)
    return x


if __name__ == "__main__":
    # TODO(synk): coords.clone().detach().requires_grad_(True) is autograd
    # bookkeeping only; no forward-pass equivalent needed.
    B, L = 2, 64                      # L = 8x8 coordinate grid flattened
    in_features, hidden_size, hidden_layers = 2, 32, 1
    out_features, style_size = 3, 16

    key = jax.random.PRNGKey(0)
    k_c, k_s, k_p = jax.random.split(key, 3)
    coords = jax.random.normal(k_c, (B, L, in_features), jnp.float32)
    style = jax.random.normal(k_s, (B, style_size), jnp.float32)
    params = init_siren_params(k_p, in_features, hidden_size, hidden_layers,
                               out_features, style_size)

    out = jax.block_until_ready(siren_forward(coords, style, params))
    ref = jax.block_until_ready(siren_reference(coords, style, params))

    assert out.shape == (B, L, out_features), out.shape
    diff = jnp.abs(out - ref)
    max_err = float(jnp.max(diff))
    mean_err = float(jnp.mean(diff))
    # The final linear layer intentionally runs as a single-pass bf16 matmul
    # (perf feedback); bf16 rounding of unit-norm weight rows dotted with 32
    # sin outputs gives ~1e-3 rms / <~1.5e-2 worst-case per-element error, and
    # the HIGHEST sin layers add only f32-reassociation noise.  A real
    # layout/math bug produces O(1) errors, so these bounds stay discriminating.
    assert max_err < 3e-2 and mean_err < 5e-3, (max_err, mean_err)
    print("KERNEL_OK")
</pallas_src>

<mosaic_0001>
module attributes {stable_mosaic.version = 11 : i64} {
  func.func @_siren_kernel(%arg0: i32, %arg1: memref<1x2x64xf32, #tpu.memory_space<vmem>>, %arg2: memref<32x2xf32, #tpu.memory_space<vmem>>, %arg3: memref<1x1x2xf32, #tpu.memory_space<vmem>>, %arg4: memref<32x32xf32, #tpu.memory_space<vmem>>, %arg5: memref<1x1x32xf32, #tpu.memory_space<vmem>>, %arg6: memref<3x32xf32, #tpu.memory_space<vmem>>, %arg7: memref<1x1x32xf32, #tpu.memory_space<vmem>>, %arg8: memref<1x3x64xf32, #tpu.memory_space<vmem>>) attributes {dimension_semantics = [#tpu.dimension_semantics<parallel>], iteration_bounds = array<i64: 2>, scalar_prefetch = 0 : i64, scratch_operands = 0 : i64, tpu.core_type = #tpu.core_type<tc>, window_params = [{transform_indices = @transform_0, window_bounds = array<i64: 1, 2, 64>}, {pipeline_mode = #tpu.pipeline_mode<synchronous>, transform_indices = @transform_1, window_bounds = array<i64: 32, 2>}, {transform_indices = @transform_2, window_bounds = array<i64: 1, 1, 2>}, {pipeline_mode = #tpu.pipeline_mode<synchronous>, transform_indices = @transform_3, window_bounds = array<i64: 32, 32>}, {transform_indices = @transform_4, window_bounds = array<i64: 1, 1, 32>}, {pipeline_mode = #tpu.pipeline_mode<synchronous>, transform_indices = @transform_5, window_bounds = array<i64: 3, 32>}, {transform_indices = @transform_6, window_bounds = array<i64: 1, 1, 32>}, {transform_indices = @transform_7, window_bounds = array<i64: 1, 3, 64>}]} {
    %c0 = arith.constant 0 : index
    %c0_0 = arith.constant 0 : index
    %c0_1 = arith.constant 0 : index
    %0 = vector.load %arg1[%c0, %c0_0, %c0_1] : memref<1x2x64xf32, #tpu.memory_space<vmem>>, vector<1x2x64xf32>
    %1 = vector.shape_cast %0 : vector<1x2x64xf32> to vector<2x64xf32>
    %c0_2 = arith.constant 0 : index
    %c0_3 = arith.constant 0 : index
    %2 = vector.load %arg2[%c0_2, %c0_3] : memref<32x2xf32, #tpu.memory_space<vmem>>, vector<32x2xf32>
    %c0_4 = arith.constant 0 : index
    %c0_5 = arith.constant 0 : index
    %c0_6 = arith.constant 0 : index
    %3 = vector.load %arg3[%c0_4, %c0_5, %c0_6] : memref<1x1x2xf32, #tpu.memory_space<vmem>>, vector<1x1x2xf32>
    %4 = vector.shape_cast %3 : vector<1x1x2xf32> to vector<1x2xf32>
    %5 = vector.broadcast %4 : vector<1x2xf32> to vector<32x2xf32>
    %6 = arith.mulf %2, %5 : vector<32x2xf32>
    %7 = arith.mulf %6, %6 : vector<32x2xf32>
    %cst = arith.constant dense<0.000000e+00> : vector<32xf32>
    %8 = vector.multi_reduction <add>, %7, %cst [1] : vector<32x2xf32> to vector<32xf32>
    %9 = vector.shape_cast %8 : vector<32xf32> to vector<32x1xf32>
    %cst_7 = arith.constant 9.99999993E-9 : f32
    %10 = vector.broadcast %cst_7 : f32 to vector<32x1xf32>
    %11 = arith.addf %9, %10 : vector<32x1xf32>
    %12 = math.rsqrt %11 : vector<32x1xf32>
    %13 = vector.broadcast %12 : vector<32x1xf32> to vector<32x2xf32>
    %14 = arith.mulf %6, %13 : vector<32x2xf32>
    %15 = vector.extract_strided_slice %14 {offsets = [0, 0], sizes = [32, 1], strides = [1, 1]} : vector<32x2xf32> to vector<32x1xf32>
    %16 = vector.extract_strided_slice %1 {offsets = [0, 0], sizes = [1, 64], strides = [1, 1]} : vector<2x64xf32> to vector<1x64xf32>
    %17 = vector.broadcast %15 : vector<32x1xf32> to vector<32x64xf32>
    %18 = vector.broadcast %16 : vector<1x64xf32> to vector<32x64xf32>
    %19 = arith.mulf %17, %18 : vector<32x64xf32>
    %20 = vector.extract_strided_slice %14 {offsets = [0, 1], sizes = [32, 1], strides = [1, 1]} : vector<32x2xf32> to vector<32x1xf32>
    %21 = vector.extract_strided_slice %1 {offsets = [1, 0], sizes = [1, 64], strides = [1, 1]} : vector<2x64xf32> to vector<1x64xf32>
    %22 = vector.broadcast %20 : vector<32x1xf32> to vector<32x64xf32>
    %23 = vector.broadcast %21 : vector<1x64xf32> to vector<32x64xf32>
    %24 = arith.mulf %22, %23 : vector<32x64xf32>
    %25 = arith.addf %19, %24 : vector<32x64xf32>
    %cst_8 = arith.constant 3.000000e+01 : f32
    %26 = vector.broadcast %cst_8 : f32 to vector<32x64xf32>
    %27 = arith.mulf %26, %25 : vector<32x64xf32>
    %28 = math.sin %27 : vector<32x64xf32>
    %c0_9 = arith.constant 0 : index
    %c0_10 = arith.constant 0 : index
    %29 = vector.load %arg4[%c0_9, %c0_10] : memref<32x32xf32, #tpu.memory_space<vmem>>, vector<32x32xf32>
    %c0_11 = arith.constant 0 : index
    %c0_12 = arith.constant 0 : index
    %c0_13 = arith.constant 0 : index
    %30 = vector.load %arg5[%c0_11, %c0_12, %c0_13] : memref<1x1x32xf32, #tpu.memory_space<vmem>>, vector<1x1x32xf32>
    %31 = vector.shape_cast %30 : vector<1x1x32xf32> to vector<1x32xf32>
    %32 = vector.broadcast %31 : vector<1x32xf32> to vector<32x32xf32>
    %33 = arith.mulf %29, %32 : vector<32x32xf32>
    %34 = arith.mulf %33, %33 : vector<32x32xf32>
    %cst_14 = arith.constant dense<0.000000e+00> : vector<32xf32>
    %35 = vector.multi_reduction <add>, %34, %cst_14 [1] : vector<32x32xf32> to vector<32xf32>
    %36 = vector.shape_cast %35 : vector<32xf32> to vector<32x1xf32>
    %cst_15 = arith.constant 9.99999993E-9 : f32
    %37 = vector.broadcast %cst_15 : f32 to vector<32x1xf32>
    %38 = arith.addf %36, %37 : vector<32x1xf32>
    %39 = math.rsqrt %38 : vector<32x1xf32>
    %40 = vector.broadcast %39 : vector<32x1xf32> to vector<32x32xf32>
    %41 = arith.mulf %33, %40 : vector<32x32xf32>
    %cst_16 = arith.constant dense<0.000000e+00> : vector<32x64xf32>
    %42 = tpu.matmul %41, %28, %cst_16 {dimension_numbers = #tpu.dot_dimension_numbers<[1], [0], [0], [1], [0, 0, 1, 1], [], []>, precision = #tpu.contract_precision<fp32>} : vector<32x32xf32>, vector<32x64xf32>, vector<32x64xf32> -> vector<32x64xf32>
    %cst_17 = arith.constant 3.000000e+01 : f32
    %43 = vector.broadcast %cst_17 : f32 to vector<32x64xf32>
    %44 = arith.mulf %43, %42 : vector<32x64xf32>
    %45 = math.sin %44 : vector<32x64xf32>
    %c0_18 = arith.constant 0 : index
    %c0_19 = arith.constant 0 : index
    %46 = vector.load %arg6[%c0_18, %c0_19] : memref<3x32xf32, #tpu.memory_space<vmem>>, vector<3x32xf32>
    %c0_20 = arith.constant 0 : index
    %c0_21 = arith.constant 0 : index
    %c0_22 = arith.constant 0 : index
    %47 = vector.load %arg7[%c0_20, %c0_21, %c0_22] : memref<1x1x32xf32, #tpu.memory_space<vmem>>, vector<1x1x32xf32>
    %48 = vector.shape_cast %47 : vector<1x1x32xf32> to vector<1x32xf32>
    %49 = vector.broadcast %48 : vector<1x32xf32> to vector<3x32xf32>
    %50 = arith.mulf %46, %49 : vector<3x32xf32>
    %51 = arith.mulf %50, %50 : vector<3x32xf32>
    %cst_23 = arith.constant dense<0.000000e+00> : vector<3xf32>
    %52 = vector.multi_reduction <add>, %51, %cst_23 [1] : vector<3x32xf32> to vector<3xf32>
    %53 = vector.shape_cast %52 : vector<3xf32> to vector<3x1xf32>
    %cst_24 = arith.constant 9.99999993E-9 : f32
    %54 = vector.broadcast %cst_24 : f32 to vector<3x1xf32>
    %55 = arith.addf %53, %54 : vector<3x1xf32>
    %56 = math.rsqrt %55 : vector<3x1xf32>
    %57 = vector.broadcast %56 : vector<3x1xf32> to vector<3x32xf32>
    %58 = arith.mulf %50, %57 : vector<3x32xf32>
    %59 = arith.truncf %58 : vector<3x32xf32> to vector<3x32xbf16>
    %60 = arith.truncf %45 : vector<32x64xf32> to vector<32x64xbf16>
    %cst_25 = arith.constant dense<0.000000e+00> : vector<3x64xf32>
    %61 = tpu.matmul %59, %60, %cst_25 {dimension_numbers = #tpu.dot_dimension_numbers<[1], [0], [0], [1], [0, 0, 1, 1], [], []>} : vector<3x32xbf16>, vector<32x64xbf16>, vector<3x64xf32> -> vector<3x64xf32>
    %c0_26 = arith.constant 0 : index
    %c0_27 = arith.constant 0 : index
    %c0_28 = arith.constant 0 : index
    %62 = vector.load %arg8[%c0_26, %c0_27, %c0_28] : memref<1x3x64xf32, #tpu.memory_space<vmem>>, vector<1x3x64xf32>
    %63 = vector.shape_cast %62 : vector<1x3x64xf32> to vector<3x64xf32>
    %64 = vector.shape_cast %61 : vector<3x64xf32> to vector<1x3x64xf32>
    tpu.vector_store %arg8[%c0_26, %c0_27, %c0_28], %64 {strides = array<i32>} : memref<1x3x64xf32, #tpu.memory_space<vmem>>, vector<1x3x64xf32>,
    return
  }
  func.func @transform_0(%arg0: i32) -> (i32, i32, i32) {
    %c0_i32 = arith.constant 0 : i32
    %c0_i32_0 = arith.constant 0 : i32
    %c0_i32_1 = arith.constant 0 : i32
    return %arg0, %c0_i32, %c0_i32_0 : i32, i32, i32
  }
  func.func @transform_1(%arg0: i32) -> (i32, i32) {
    %c0_i32 = arith.constant 0 : i32
    %c0_i32_0 = arith.constant 0 : i32
    %c0_i32_1 = arith.constant 0 : i32
    return %c0_i32, %c0_i32_0 : i32, i32
  }
  func.func @transform_2(%arg0: i32) -> (i32, i32, i32) {
    %c0_i32 = arith.constant 0 : i32
    %c0_i32_0 = arith.constant 0 : i32
    %c0_i32_1 = arith.constant 0 : i32
    return %arg0, %c0_i32, %c0_i32_0 : i32, i32, i32
  }
  func.func @transform_3(%arg0: i32) -> (i32, i32) {
    %c0_i32 = arith.constant 0 : i32
    %c0_i32_0 = arith.constant 0 : i32
    %c0_i32_1 = arith.constant 0 : i32
    return %c0_i32, %c0_i32_0 : i32, i32
  }
  func.func @transform_4(%arg0: i32) -> (i32, i32, i32) {
    %c0_i32 = arith.constant 0 : i32
    %c0_i32_0 = arith.constant 0 : i32
    %c0_i32_1 = arith.constant 0 : i32
    return %arg0, %c0_i32, %c0_i32_0 : i32, i32, i32
  }
  func.func @transform_5(%arg0: i32) -> (i32, i32) {
    %c0_i32 = arith.constant 0 : i32
    %c0_i32_0 = arith.constant 0 : i32
    %c0_i32_1 = arith.constant 0 : i32
    return %c0_i32, %c0_i32_0 : i32, i32
  }
  func.func @transform_6(%arg0: i32) -> (i32, i32, i32) {
    %c0_i32 = arith.constant 0 : i32
    %c0_i32_0 = arith.constant 0 : i32
    %c0_i32_1 = arith.constant 0 : i32
    return %arg0, %c0_i32, %c0_i32_0 : i32, i32, i32
  }
  func.func @transform_7(%arg0: i32) -> (i32, i32, i32) {
    %c0_i32 = arith.constant 0 : i32
    %c0_i32_0 = arith.constant 0 : i32
    %c0_i32_1 = arith.constant 0 : i32
    return %arg0, %c0_i32, %c0_i32_0 : i32, i32, i32
  }
}

</mosaic_0001>

<bundles_post_ra>
// kernel: _siren_forward_jit.1
= control target key start
LH: loop header
LB: loop body
LE: loop exit
PB: predicated region body
PF: predicated region fallthrough
CT: control target
= control target key end

     0   :  { %s2493_s24 = smov 0   ;;  %s3260_s0 = inlined_call_operand.vmem [shape: f32[2,2,64], index: 0, kind: input, shape index: {}]   ;;  %s3261_s1 = inlined_call_operand.vmem [shape: f32[32,2], index: 1, kind: input, shape index: {}]   ;;  %s3262_s2 = inlined_call_operand.vmem [shape: f32[2,1,2], index: 2, kind: input, shape index: {}]   ;;  %s3263_s3 = inlined_call_operand.vmem [shape: f32[32,32], index: 3, kind: input, shape index: {}]   ;;  %s3264_s4 = inlined_call_operand.vmem [shape: f32[2,1,32], index: 4, kind: input, shape index: {}]   ;;  %s3265_s5 = inlined_call_operand.vmem [shape: f32[3,32], index: 5, kind: input, shape index: {}]   ;;  %s3266_s6 = inlined_call_operand.vmem [shape: f32[2,1,32], index: 6, kind: input, shape index: {}]   ;;  %s3267_s7 = inlined_call_operand.vmem [shape: f32[2,3,64], index: 7, kind: output, shape index: {}]  }
   0x1 LB: > { %s2073_s25 = sadd.s32 4294967295, %s2441_s24   ;;  %p2077_p0 = scmp.ge.s32.totalorder %s2441_s24, 1  ;;  %s2441_s24 = sphi %s2493_s24, %s17_s24  }
   0x2   : > { %p260_p1 = scmp.lt.s32.totalorder %s2441_s24, 3 }
   0x4   : > { %p261_p2 = pnand %p2077_p0, %p260_p1 }
   0x5   : > { %p299_p3 = scmp.lt.s32.totalorder (!%p261_p2), %s2073_s25, 1  ;;  %v318_v0 = vld [vmem:[%s3261_s1] sm:$0xff] (!%p261_p2)  ;;  %v319_v1 = vld [vmem:[%s3261_s1 + $0x8] sm:$0xff] (!%p261_p2)  ;;  %v320_v2 = vld [vmem:[%s3261_s1 + $0x10] sm:$0xff] (!%p261_p2)  ;;  %vm337_vm0 = vcmask (!%p261_p2), 15360   ;;  %v2443_v17 = vmov (!%p261_p2), 0   ;;  %v382_v52 = vlaneseq (!%p261_p2) }
   0x6   : > { %264 = sbr.rel (%p261_p2) target bundleno = 1067 (0x42b), region = 48  ;;  %v321_v3 = vld [vmem:[%s3261_s1 + $0x18] sm:$0xff] (!%p261_p2)  ;;  %2379 = vset.pattern.permute.xlu0 (!%p261_p2), %v2443_v17  ;;  %2380 = vset.pattern.permute.xlu1 (!%p261_p2), %v2443_v17  ;;  %v2444_v30 = vmov (!%p261_p2), 1   ;;  %v839_v34 = vld [vmem:[%s3263_s3 + $0x8] sm:$0xff] (!%p261_p2)  ;;  %v840_v38 = vld [vmem:[%s3263_s3 + $0x10] sm:$0xff] (!%p261_p2)  ;;  %vm857_vm1 = vcmask (!%p261_p2), 261120  }
   0x7   : > { %v838_v44 = vld [vmem:[%s3263_s3] sm:$0xff] (!%p261_p2)  ;;  %v841_v46 = vld [vmem:[%s3263_s3 + $0x18] sm:$0xff] (!%p261_p2)  ;;  %v383_v53 = vshrl.u32 (!%p261_p2), %v382_v52, 7 }
   0x9   : > { %v384_v54 = vsub.s32 (!%p261_p2), 0, %v383_v53  ;;  %v408_v55 = vsub.s32 (!%p261_p2), 1, %v383_v53 }
   0xd   : > { %s3283_s25 = smov (!%p299_p3, %s2073_s25), 1 }
   0xe   : > { %s305_s13 = scalar_lea.vmem %s3262_s2, %s3283_s25  ;;  %s308_s16 = scalar_lea.vmem %s3264_s4, %s3283_s25 }
   0xf   : > { %v2080_v4 = vld [vmem:[%s305_s13] ss:$0 sm:$0xff]  ;;  %s2078_s27 = sshll.u32 %s3283_s25, 1  ;;  %s311_s10 = scalar_lea.vmem %s3266_s6, %s3283_s25 }
  0x10   : > { %v329_v5 = vmul.f32 %v2080_v4, %v318_v0  ;;  %v330_v6 = vmul.f32 %v2080_v4, %v319_v1  ;;  %v331_v7 = vmul.f32 %v2080_v4, %v320_v2  ;;  %v332_v8 = vmul.f32 %v2080_v4, %v321_v3  ;;  %v2097_v35 = vld [vmem:[%s308_s16] ss:$0 sm:$0xff]  ;;  %s302_s30 = scalar_lea.vmem %s3260_s0, %s2078_s27  ;;  %s2079_s13 = sshll.u32 %s3283_s25, 2 }
  0x11   : > { %v2526_v37 = vmul.f32 %v2097_v35, %v839_v34  ;;  %v2533_v40 = vmul.f32 %v2097_v35, %v840_v38  ;;  %v2542_v45 = vmul.f32 %v2097_v35, %v838_v44  ;;  %v2549_v48 = vmul.f32 %v2097_v35, %v841_v46  ;;  %v317_v56 = vld [vmem:[%s302_s30] sm:$0x3]  ;;  %s315_s16 = scalar_lea.vmem %s3267_s7, %s2079_s13 }
  0x12   : > { %v333_v9 = vmul.f32 %v329_v5, %v329_v5  ;;  %v334_v10 = vmul.f32 %v330_v6, %v330_v6  ;;  %v335_v11 = vmul.f32 %v331_v7, %v331_v7  ;;  %v336_v12 = vmul.f32 %v332_v8, %v332_v8 }
  0x13   : > { %v854_v39 = vmul.f32 %v2526_v37, %v2526_v37  ;;  %v855_v42 = vmul.f32 %v2533_v40, %v2533_v40  ;;  %v853_v47 = vmul.f32 %v2542_v45, %v2542_v45  ;;  %v856_v50 = vmul.f32 %v2549_v48, %v2549_v48 }
  0x14   : > { %v338_v13 = vsel %vm337_vm0, %v333_v9, 0.0  ;;  %v344_v14 = vsel %vm337_vm0, %v335_v11, 0.0  ;;  %v341_v15 = vsel %vm337_vm0, %v334_v10, 0.0  ;;  %v347_v16 = vsel %vm337_vm0, %v336_v12, 0.0 }
  0x15   : > { %339 = vadd.xlane.f32.xlu0 %v338_v13  ;;  %345 = vadd.xlane.f32.xlu1 %v344_v14  ;;  %v861_v41 = vsel %vm857_vm1, %v854_v39, 0.0  ;;  %v864_v43 = vsel %vm857_vm1, %v855_v42, 0.0  ;;  %v858_v49 = vsel %vm857_vm1, %v853_v47, 0.0  ;;  %v867_v51 = vsel %vm857_vm1, %v856_v50, 0.0 }
  0x16   : > { %v2559_v58 = vrot.slane %v317_v56, %v384_v54  ;;  %v2561_v59 = vrot.slane %v317_v56, %v408_v55  ;;  %v2449_v35 = vmov 920167782   ;;  %v2450_v46 = vmov 1326507024  }
  0x19   : > { %342 = vadd.xlane.f32.xlu0 %v341_v15  ;;  %348 = vadd.xlane.f32.xlu1 %v347_v16 }
  0xa2   : > { %v340_v18 = vpop.xlane.xlu0 %339  ;;  %v346_v22 = vpop.xlane.xlu1 %345 }
  0xa3   : > { %v350_v19 = vadd.f32 1e-08, %v340_v18  ;;  %v352_v24 = vadd.f32 1e-08, %v346_v22 }
  0xa5   : > { %2385 = vrsqrt.f32 %v350_v19 }
  0xa6   : > { %v343_v20 = vpop.xlane.xlu0 %342  ;;  %v349_v26 = vpop.xlane.xlu1 %348 }
  0xa7   : > { %v351_v21 = vadd.f32 1e-08, %v343_v20  ;;  %v353_v28 = vadd.f32 1e-08, %v349_v26  ;;  %v2445_v26 = vmov 683565275  }
  0xa9   : > { %2387 = vrsqrt.f32 %v351_v21 }
  0xaa   : > { %2389 = vrsqrt.f32 %v352_v24 }
  0xab   : > { %2391 = vrsqrt.f32 %v353_v28  ;;  %v2446_v28 = vmov 2475754826  }
  0xaf   : > { %v2386_v23 = vpop.eup %2385 }
  0xb0   : > { %v358_v25 = vmul.f32 %v2386_v23, %v329_v5 }
  0xb2   : > { %364 = vperm.xlu0 %2379, %v358_v25  }
  0xb3   : > { %v2388_v27 = vpop.eup %2387 }
  0xb4   : > { %v359_v29 = vmul.f32 %v2388_v27, %v330_v6  ;;  %v2390_v31 = vpop.eup %2389 }
  0xb5   : > { %v360_v32 = vmul.f32 %v2390_v31, %v331_v7  ;;  %v2392_v33 = vpop.eup %2391  ;;  %v2447_v31 = vmov 2131351028  }
  0xb6   : > { %369 = vperm.xlu1 %2380, %v359_v29   ;;  %2384 = vset.pattern.permute.xlu0 %v2444_v30  ;;  %v361_v36 = vmul.f32 %v2392_v33, %v332_v8  ;;  %v2448_v33 = vmov 2102212464  }
  0xba   : > { %2381 = vset.pattern.permute.xlu1 %v2444_v30 }
  0xbb   : > { %391 = vperm.xlu1 %2381, %v358_v25  }
  0xbf   : > { %395 = vperm.xlu1 %2381, %v359_v29  }
  0xc3   : > { %2382 = vset.pattern.permute.xlu1 %v2443_v17 }
  0xc4   : > { %374 = vperm.xlu1 %2382, %v360_v32  }
  0xc8   : > { %379 = vperm.xlu1 %2382, %v361_v36  }
  0xcc   : > { %2383 = vset.pattern.permute.xlu1 %v2444_v30 }
  0xcd   : > { %399 = vperm.xlu1 %2383, %v360_v32  }
  0xd1   : > { %403 = vperm.xlu1 %2383, %v361_v36   ;;  %862 = vadd.xlane.f32.xlu0 %v861_v41 }
  0xd5   : > { %865 = vadd.xlane.f32.xlu0 %v864_v43 }
  0xf5   : > { %859 = vadd.xlane.f32.xlu1 %v858_v49 }
  0xf9   : > { %868 = vadd.xlane.f32.xlu1 %v867_v51 }
 0x131   : > { %v365_v60 = vpop.permute.xlu0 %364 }
 0x132   : > { %v386_v62 = vmul.f32 %v2559_v58, %v365_v60 }
 0x135   : > { %v370_v57 = vpop.permute.xlu1 %369 }
 0x136   : > { %v387_v4 = vmul.f32 %v2559_v58, %v370_v57 }
 0x13a   : > { %v392_v61 = vpop.permute.xlu1 %391 }
 0x13b   : > { %v410_v63 = vmul.f32 %v2561_v59, %v392_v61 }
 0x13d   : > { %v414_v0 = vadd.f32 %v410_v63, %v386_v62 }
 0x13e   : > { %v396_v1 = vpop.permute.xlu1 %395 }
 0x13f   : > { %v2565_v2 = vmul.f32 30.0, %v414_v0  ;;  %v411_v3 = vmul.f32 %v2561_v59, %v396_v1 }
 0x141   : > { %v422_v5 = vand.u32 2147483647, %v2565_v2  ;;  %v425_v6 = vand.u32 2139095040, %v2565_v2  ;;  %v415_v7 = vadd.f32 %v411_v3, %v387_v4  ;;  %vm424_vm14 = vcmp.lt.s32.totalorder %v2565_v2, 0 }
 0x143   : > { %v426_v8 = vshrl.u32 %v425_v6, 23  ;;  %v429_v9 = vand.u32 8388607, %v422_v5  ;;  %v2573_v10 = vmul.f32 30.0, %v415_v7  ;;  %v375_v18 = vpop.permute.xlu1 %374  ;;  %vm2671_vm0 = vcmp.le.f32.partialorder %v422_v5, 0.7853982 }
 0x145   : > { %v2081_v11 = vadd.s32 4294967169, %v426_v8  ;;  %v526_v12 = vand.u32 2147483647, %v2573_v10  ;;  %v529_v13 = vand.u32 2139095040, %v2573_v10  ;;  %v430_v15 = vor.u32 8388608, %v429_v9 }
 0x147   : > { %v432_v14 = vadd.s32 1, %v2081_v11  ;;  %v530_v16 = vshrl.u32 %v529_v13, 23  ;;  %v533_v17 = vand.u32 8388607, %v526_v12  ;;  %v2579_v23 = vshll.u32 %v430_v15, 8  ;;  %v2589_v42 = vpop.permute.xlu1 %379 }
 0x148   : > { %v388_v13 = vmul.f32 %v2559_v58, %v375_v18 }
 0x149   : > { %vm433_vm2 = vcmp.gt.s32.totalorder %v432_v14, 0  ;;  %v2085_v20 = vadd.s32 4294967169, %v530_v16  ;;  %v534_v24 = vor.u32 8388608, %v533_v17 }
 0x14a   : > { %v434_v19 = vsel %vm433_vm2, %v432_v14, 0 }
 0x14b   : > { %v435_v21 = vshrl.u32 %v434_v19, 5  ;;  %v436_v22 = vand.u32 31, %v434_v19  ;;  %v536_v30 = vadd.s32 1, %v2085_v20  ;;  %v2603_v11 = vshll.u32 %v534_v24, 8 }
 0x14c   : > { %v400_v7 = vpop.permute.xlu1 %399 }
 0x14d   : > { %v437_v25 = vsub.s32 32, %v436_v22  ;;  %v439_v27 = vshll.u32 %v2445_v26, %v436_v22  ;;  %v442_v29 = vshll.u32 %v2446_v28, %v436_v22  ;;  %v445_v32 = vshll.u32 %v2447_v31, %v436_v22 }
 0x14e   : > { %v448_v34 = vshll.u32 %v2448_v33, %v436_v22  ;;  %v451_v36 = vshll.u32 %v2449_v35, %v436_v22  ;;  %vm454_vm3 = vcmp.lt.s32.totalorder %v435_v21, 1  ;;  %vm455_vm4 = vcmp.lt.s32.totalorder %v435_v21, 2 }
 0x14f   : > { %v440_v38 = vshrl.u32 %v2446_v28, %v437_v25  ;;  %v443_v39 = vshrl.u32 %v2447_v31, %v437_v25  ;;  %v446_v41 = vshrl.u32 %v2448_v33, %v437_v25  ;;  %v438_v43 = vshrl.u32 %v2445_v26, %v437_v25 }
 0x150   : > { %v449_v44 = vshrl.u32 %v2449_v35, %v437_v25  ;;  %v452_v47 = vshrl.u32 %v2450_v46, %v437_v25  ;;  %vm456_vm5 = vcmp.lt.s32.totalorder %v435_v21, 3  ;;  %vm537_vm6 = vcmp.gt.s32.totalorder %v536_v30, 0 }
 0x151   : > { %v441_v49 = vor.u32 %v440_v38, %v439_v27  ;;  %v444_v50 = vor.u32 %v443_v39, %v442_v29  ;;  %v447_v51 = vor.u32 %v446_v41, %v445_v32  ;;  %vm457_vm7 = vcmp.lt.s32.totalorder %v435_v21, 4 }
 0x152   : > { %v450_v52 = vor.u32 %v449_v44, %v448_v34  ;;  %v453_v53 = vor.u32 %v452_v47, %v451_v36  ;;  %v538_v54 = vsel %vm537_vm6, %v536_v30, 0  ;;  %v412_v21 = vmul.f32 %v2561_v59, %v400_v7 }
 0x153   : > { %v458_v55 = vsel %vm454_vm3, %v438_v43, %v441_v49  ;;  %v459_v56 = vsel %vm457_vm7, %v447_v51, 2102212464  ;;  %v462_v57 = vsel %vm454_vm3, %v441_v49, %v444_v50  ;;  %v466_v60 = vsel %vm454_vm3, %v444_v50, %v447_v51 }
 0x154   : > { %v460_v61 = vsel %vm456_vm5, %v444_v50, %v459_v56  ;;  %v463_v62 = vsel %vm457_vm7, %v450_v52, 920167782  ;;  %v467_v63 = vsel %vm457_vm7, %v453_v53, 1326507024  ;;  %v539_v0 = vshrl.u32 %v538_v54, 5 }
 0x155   : > { %v461_v1 = vsel %vm455_vm4, %v458_v55, %v460_v61  ;;  %v464_v3 = vsel %vm456_vm5, %v447_v51, %v463_v62  ;;  %v468_v4 = vsel %vm456_vm5, %v450_v52, %v467_v63  ;;  %v540_v6 = vand.u32 31, %v538_v54 }
 0x156   : > { %v465_v8 = vsel %vm455_vm4, %v462_v57, %v464_v3  ;;  %v469_v9 = vsel %vm455_vm4, %v466_v60, %v468_v4  ;;  %v477_v19 = vmul.u32 %v2579_v23, %v461_v1  ;;  %vm558_vm8 = vcmp.lt.s32.totalorder %v539_v0, 1 }
 0x157   : > { %v2607_v14 = vmul.u32.u64.low %v2579_v23, %v469_v9  ;;  %v2608_v15 = vmul.u32.u64.high %v2579_v23, %v469_v9, %v2607_v14  ;;  %v2611_v16 = vmul.u32.u64.low %v2579_v23, %v465_v8  ;;  %v2612_v17 = vmul.u32.u64.high %v2579_v23, %v465_v8, %v2611_v16 }
 0x158   : > { %v541_v20 = vsub.s32 32, %v540_v6  ;;  %v543_v22 = vshll.u32 %v2445_v26, %v540_v6  ;;  %v546_v24 = vshll.u32 %v2446_v28, %v540_v6  ;;  %v549_v18 = vshll.u32 %v2447_v31, %v540_v6 }
 0x159   : > { %v552_v25 = vshll.u32 %v2448_v33, %v540_v6  ;;  %v555_v23 = vshll.u32 %v2449_v35, %v540_v6  ;;  %vm479_vm9 = vc.u32 %v2608_v15, %v2611_v16  ;;  %v480_v32 = vadd.s32 1, %v2612_v17 }
 0x15a   : > { %v544_v27 = vshrl.u32 %v2446_v28, %v541_v20  ;;  %v547_v29 = vshrl.u32 %v2447_v31, %v541_v20  ;;  %v550_v30 = vshrl.u32 %v2448_v33, %v541_v20  ;;  %v553_v34 = vshrl.u32 %v2449_v35, %v541_v20 }
 0x15b   : > { %vm559_vm10 = vcmp.lt.s32.totalorder %v539_v0, 2  ;;  %v556_v41 = vshrl.u32 %v2450_v46, %v541_v20  ;;  %v481_v43 = vsel %vm479_vm9, %v480_v32, %v2612_v17  ;;  %vm561_vm11 = vcmp.lt.s32.totalorder %v539_v0, 4 }
 0x15c   : > { %v545_v36 = vor.u32 %v544_v27, %v543_v22  ;;  %v548_v38 = vor.u32 %v547_v29, %v546_v24  ;;  %v551_v39 = vor.u32 %v550_v30, %v549_v18  ;;  %v554_v44 = vor.u32 %v553_v34, %v552_v25 }
 0x15d   : > { %v416_v47 = vadd.f32 %v412_v21, %v388_v13  ;;  %v482_v49 = vadd.s32 %v481_v43, %v477_v19  ;;  %v542_v50 = vshrl.u32 %v2445_v26, %v541_v20  ;;  %v557_v51 = vor.u32 %v556_v41, %v555_v23  ;;  %v404_v20 = vpop.permute.xlu1 %403 }
 0x15e   : > { %v563_v52 = vsel %vm561_vm11, %v551_v39, 2102212464  ;;  %vm560_vm12 = vcmp.lt.s32.totalorder %v539_v0, 3  ;;  %v566_v53 = vsel %vm558_vm8, %v545_v36, %v548_v38  ;;  %v567_v54 = vsel %vm561_vm11, %v554_v44, 920167782 }
 0x15f   : > { %v570_v55 = vsel %vm558_vm8, %v548_v38, %v551_v39  ;;  %v483_v56 = vadd.s32 536870912, %v482_v49  ;;  %v562_v57 = vsel %vm558_vm8, %v542_v50, %v545_v36  ;;  %v568_v60 = vsel %vm560_vm12, %v551_v39, %v567_v54 }
 0x160   : > { %v571_v61 = vsel %vm561_vm11, %v557_v51, 1326507024  ;;  %v564_v62 = vsel %vm560_vm12, %v548_v38, %v563_v52  ;;  %v569_v63 = vsel %vm559_vm10, %v566_v53, %v568_v60  ;;  %v2636_v3 = vmul.f32 30.0, %v416_v47 }
 0x161   : > { %v572_v1 = vsel %vm560_vm12, %v554_v44, %v571_v61  ;;  %v484_v4 = vshrl.u32 %v483_v56, 30  ;;  %v2640_v7 = vmul.u32.u64.low %v2603_v11, %v569_v63  ;;  %v2641_v8 = vmul.u32.u64.high %v2603_v11, %v569_v63, %v2640_v7 }
 0x162   : > { %v573_v6 = vsel %vm559_vm10, %v570_v55, %v572_v1  ;;  %v565_v17 = vsel %vm559_vm10, %v562_v57, %v564_v62  ;;  %v633_v19 = vand.u32 2139095040, %v2636_v3  ;;  %v630_v25 = vand.u32 2147483647, %v2636_v3 }
 0x163   : > { %v2644_v9 = vmul.u32.u64.low %v2603_v11, %v573_v6  ;;  %v2645_v13 = vmul.u32.u64.high %v2603_v11, %v573_v6, %v2644_v9  ;;  %v485_v14 = vshll.u32 %v484_v4, 30  ;;  %v584_v22 = vadd.s32 1, %v2641_v8 }
 0x164   : > { %v634_v24 = vshrl.u32 %v633_v19, 23  ;;  %v581_v18 = vmul.u32 %v2603_v11, %v565_v17  ;;  %v413_v27 = vmul.f32 %v2561_v59, %v404_v20  ;;  %v389_v32 = vmul.f32 %v2559_v58, %v2589_v42 }
 0x165   : > { %v486_v21 = vsub.s32 %v482_v49, %v485_v14  ;;  %vm583_vm13 = vc.u32 %v2645_v13, %v2640_v7  ;;  %v508_v36 = vsub.s32 4, %v484_v4  ;;  %v637_v11 = vand.u32 8388607, %v630_v25 }
 0x166   : > { %v585_v30 = vsel %vm583_vm13, %v584_v22, %v2641_v8  ;;  %v2089_v0 = vadd.s32 4294967169, %v634_v24  ;;  %v417_v41 = vadd.f32 %v413_v27, %v389_v32  ;;  %v478_v53 = vadd.s32 %v2611_v16, %v2608_v15 }
 0x167   : > { %v488_v29 = vsub.s32 0, %v486_v21  ;;  %v586_v23 = vadd.s32 %v585_v30, %v581_v18  ;;  %v2664_v47 = vsel %vm424_vm14, %v508_v36, %v484_v4  ;;  %v638_v49 = vor.u32 8388608, %v637_v11 }
 0x168   : > { %v640_v38 = vadd.s32 1, %v2089_v0  ;;  %v2667_v51 = vmul.f32 30.0, %v417_v41  ;;  %v511_v61 = vsel %vm2671_vm0, 0, %v2664_v47  ;;  %v582_v62 = vadd.s32 %v2640_v7, %v2645_v13 }
 0x169   : > { %v2082_v34 = vmin.u32 %v488_v29, %v486_v21  ;;  %v587_v39 = vadd.s32 536870912, %v586_v23  ;;  %v2685_v1 = vshll.u32 %v638_v49, 8  ;;  %vm528_vm3 = vcmp.lt.s32.totalorder %v2573_v10, 0 }
 0x16a   : > { %vm641_vm15 = vcmp.gt.s32.totalorder %v640_v38, 0  ;;  %v737_v15 = vand.u32 2139095040, %v2667_v51  ;;  %vm2755_vm9 = vcmp.le.f32.partialorder %v526_v12, 0.7853982  ;;  %vm514_vm12 = vweird.f32 %v2565_v2 }
 0x16b   : > { %v490_v43 = vclz %v2082_v34  ;;  %v2660_v59 = vshrl.u32 %v587_v39, 30  ;;  %v642_v58 = vsel %vm641_vm15, %v640_v38, 0 }
 0x16c   : > { %v644_v50 = vand.u32 31, %v642_v58  ;;  %v2690_v14 = vshrl.u32 %v642_v58, 5  ;;  %v738_v27 = vshrl.u32 %v737_v15, 23 }
 0x16d   : > { %v2083_v44 = vadd.s32 4294967294, %v490_v43  ;;  %v589_v42 = vshll.u32 %v2660_v59, 30  ;;  %v612_v63 = vsub.s32 4, %v2660_v59 }
 0x16e   : > { %v645_v56 = vsub.s32 32, %v644_v50  ;;  %v647_v17 = vshll.u32 %v2445_v26, %v644_v50  ;;  %v650_v20 = vshll.u32 %v2446_v28, %v644_v50  ;;  %v653_v18 = vshll.u32 %v2447_v31, %v644_v50 }
 0x16f   : > { %vm2084_vm2 = vcmp.lt.s32.totalorder %v2083_v44, 0  ;;  %v2677_v55 = vsub.s32 %v586_v23, %v589_v42  ;;  %v656_v36 = vshll.u32 %v2448_v33, %v644_v50  ;;  %v659_v11 = vshll.u32 %v2449_v35, %v644_v50 }
 0x170   : > { %v493_v54 = vsel %vm2084_vm2, 0, %v2083_v44  ;;  %v648_v8 = vshrl.u32 %v2446_v28, %v645_v56  ;;  %v651_v7 = vshrl.u32 %v2447_v31, %v645_v56  ;;  %v654_v22 = vshrl.u32 %v2448_v33, %v645_v56 }
 0x171   : > { %v494_v57 = vsub.s32 32, %v493_v54  ;;  %v498_v60 = vsub.s32 4294967266, %v493_v54  ;;  %v592_v5 = vsub.s32 0, %v2677_v55  ;;  %v495_v16 = vshll.u32 %v486_v21, %v493_v54 }
 0x172   : > { %v646_v21 = vshrl.u32 %v2445_v26, %v645_v56  ;;  %v649_v0 = vor.u32 %v648_v8, %v647_v17  ;;  %v652_v23 = vor.u32 %v651_v7, %v650_v20  ;;  %v655_v34 = vor.u32 %v654_v22, %v653_v18 }
 0x173   : > { %v496_v4 = vshrl.u32 %v478_v53, %v494_v57  ;;  %v499_v6 = vadd.s32 127, %v498_v60  ;;  %v2086_v9 = vmin.u32 %v592_v5, %v2677_v55  ;;  %v657_v38 = vshrl.u32 %v2449_v35, %v645_v56 }
 0x174   : > { %v660_v41 = vshrl.u32 %v2450_v46, %v645_v56  ;;  %vm662_vm4 = vcmp.lt.s32.totalorder %v2690_v14, 1  ;;  %vm663_vm6 = vcmp.lt.s32.totalorder %v2690_v14, 2  ;;  %vm664_vm7 = vcmp.lt.s32.totalorder %v2690_v14, 3 }
 0x175   : > { %v497_v13 = vor.u32 %v496_v4, %v495_v16  ;;  %v500_v19 = vshll.u32 %v499_v6, 23  ;;  %v594_v24 = vclz %v2086_v9  ;;  %v658_v43 = vor.u32 %v657_v38, %v656_v36 }
 0x176   : > { %v661_v42 = vor.u32 %v660_v41, %v659_v11  ;;  %vm665_vm8 = vcmp.lt.s32.totalorder %v2690_v14, 4  ;;  %v666_v50 = vsel %vm662_vm4, %v646_v21, %v649_v0  ;;  %v670_v60 = vsel %vm662_vm4, %v649_v0, %v652_v23 }
 0x177   : > { %v501_v29 = vor.u32 4788187, %v500_v19  ;;  %v504_v30 = vcvt.s32.f32 %v497_v13  ;;  %v2087_v32 = vadd.s32 4294967294, %v594_v24  ;;  %v667_v54 = vsel %vm665_vm8, %v655_v34, 2102212464 }
 0x178   : > { %v671_v5 = vsel %vm665_vm8, %v658_v43, 920167782  ;;  %v668_v4 = vsel %vm664_vm7, %v652_v23, %v667_v54  ;;  %v674_v9 = vsel %vm662_vm4, %v652_v23, %v655_v34  ;;  %v675_v17 = vsel %vm665_vm8, %v661_v42, 1326507024 }
 0x179   : > { %v502_v39 = vand.u32 2147483647, %v501_v29  ;;  %vm2088_vm5 = vcmp.lt.s32.totalorder %v2087_v32, 0  ;;  %v672_v6 = vsel %vm664_vm7, %v655_v34, %v671_v5  ;;  %v676_v19 = vsel %vm664_vm7, %v658_v43, %v675_v17 }
 0x17a   : > { %v597_v58 = vsel %vm2088_vm5, 0, %v2087_v32  ;;  %v677_v20 = vsel %vm663_vm6, %v674_v9, %v676_v19  ;;  %v515_v21 = vadd.s32 3, %v511_v61  ;;  %v613_v29 = vsel %vm528_vm3, %v612_v63, %v2660_v59 }
 0x17b   : > { %v505_v44 = vmul.f32 %v504_v30, %v502_v39  ;;  %v598_v49 = vsub.s32 32, %v597_v58  ;;  %v602_v53 = vsub.s32 4294967266, %v597_v58  ;;  %v599_v57 = vshll.u32 %v2677_v55, %v597_v58 }
 0x17c   : > { %v673_v55 = vsel %vm663_vm6, %v670_v60, %v672_v6  ;;  %v2750_v30 = vmul.u32.u64.low %v2685_v1, %v677_v20  ;;  %v2751_v0 = vmul.u32.u64.high %v2685_v1, %v677_v20, %v2750_v30  ;;  %v2093_v23 = vadd.s32 4294967169, %v738_v27 }
 0x17d   : > { %v506_v56 = vxor.u32 2147483648, %v505_v44  ;;  %v600_v15 = vshrl.u32 %v582_v62, %v598_v49  ;;  %v603_v16 = vadd.s32 127, %v602_v53  ;;  %v669_v61 = vsel %vm663_vm6, %v666_v50, %v668_v4 }
 0x17e   : > { %v2736_v22 = vmul.u32.u64.low %v2685_v1, %v673_v55  ;;  %v2737_v24 = vmul.u32.u64.high %v2685_v1, %v673_v55, %v2736_v22  ;;  %v615_v34 = vsel %vm2755_vm9, 0, %v613_v29  ;;  %v734_v63 = vand.u32 2147483647, %v2667_v51 }
 0x17f   : > { %v507_v8 = vsel %vm424_vm14, %v506_v56, %v505_v44  ;;  %v601_v7 = vor.u32 %v600_v15, %v599_v57  ;;  %v604_v13 = vshll.u32 %v603_v16, 23  ;;  %v744_v36 = vadd.s32 1, %v2093_v23 }
 0x180   : > { %v510_v62 = vsel %vm2671_vm0, %v2565_v2, %v507_v8  ;;  %v688_v59 = vadd.s32 1, %v2737_v24  ;;  %v516_v27 = vand.u32 3, %v515_v21  ;;  %v685_v12 = vmul.u32 %v2685_v1, %v669_v61 }
 0x181   : > { %2393 = vcosq.f32 %v510_v62  ;;  %v605_v18 = vor.u32 4788187, %v604_v13  ;;  %v608_v52 = vcvt.s32.f32 %v601_v7  ;;  %vm687_vm10 = vc.u32 %v2751_v0, %v2736_v22 }
 0x182   : > { %2395 = vsinq.f32 %v510_v62  ;;  %vm745_vm11 = vcmp.gt.s32.totalorder %v744_v36, 0  ;;  %v619_v11 = vadd.s32 3, %v615_v34  ;;  %v689_v14 = vsel %vm687_vm10, %v688_v59, %v2737_v24  ;;  %v860_v43 = vpop.xlane.xlu1 %859 }
 0x183   : > { %v606_v47 = vand.u32 2147483647, %v605_v18  ;;  %v746_v41 = vsel %vm745_vm11, %v744_v36, 0  ;;  %v690_v44 = vadd.s32 %v689_v14, %v685_v12  ;;  %v741_v58 = vand.u32 8388607, %v734_v63 }
 0x184   : > { %v748_v42 = vand.u32 31, %v746_v41  ;;  %vm517_vm13 = vcmp.lt.s32.totalorder %v516_v27, 2  ;;  %vm518_vm14 = vcmp.eq.s32.totalorder %v516_v27, 0  ;;  %v870_v56 = vadd.f32 1e-08, %v860_v43 }
 0x185   : > { %v609_v38 = vmul.f32 %v608_v52, %v606_v47  ;;  %v691_v50 = vadd.s32 536870912, %v690_v44  ;;  %vm521_vm15 = vcmp.eq.s32.totalorder %v516_v27, 2  ;;  %v2777_v5 = vand.u32 3, %v619_v11 }
 0x186   : > { %v749_v54 = vsub.s32 32, %v748_v42  ;;  %v742_v4 = vor.u32 8388608, %v741_v58  ;;  %v757_v7 = vshll.u32 %v2447_v31, %v748_v42  ;;  %v747_v19 = vshrl.u32 %v746_v41, 5 }
 0x187   : > { %v610_v39 = vxor.u32 2147483648, %v609_v38  ;;  %v2779_v16 = vshrl.u32 %v691_v50, 30  ;;  %v751_v20 = vshll.u32 %v2445_v26, %v748_v42  ;;  %v754_v24 = vshll.u32 %v2446_v28, %v748_v42 }
 0x188   : > { %v752_v8 = vshrl.u32 %v2446_v28, %v749_v54  ;;  %v755_v55 = vshrl.u32 %v2447_v31, %v749_v54  ;;  %v758_v9 = vshrl.u32 %v2448_v33, %v749_v54  ;;  %v760_v29 = vshll.u32 %v2448_v33, %v748_v42 }
 0x189   : > { %v611_v1 = vsel %vm528_vm3, %v610_v39, %v609_v38  ;;  %v693_v62 = vshll.u32 %v2779_v16, 30  ;;  %v761_v30 = vshrl.u32 %v2449_v35, %v749_v54  ;;  %vm621_vm0 = vcmp.lt.s32.totalorder %v2777_v5, 2 }
 0x18a   : > { %v614_v53 = vsel %vm2755_vm9, %v2573_v10, %v611_v1  ;;  %v759_v18 = vor.u32 %v758_v9, %v757_v7  ;;  %vm622_vm2 = vcmp.eq.s32.totalorder %v2777_v5, 0  ;;  %v753_v23 = vor.u32 %v752_v8, %v751_v20 }
 0x18b   : > { %v2394_v49 = vpop.eup %2393  ;;  %2397 = vcosq.f32 %v614_v53  ;;  %v2790_v21 = vsub.s32 %v690_v44, %v693_v62  ;;  %v756_v32 = vor.u32 %v755_v55, %v754_v24  ;;  %v764_v47 = vshrl.u32 %v2450_v46, %v749_v54 }
 0x18c   : > { %v2396_v57 = vpop.eup %2395  ;;  %v522_v60 = vxor.u32 2147483648, %v2394_v49  ;;  %2399 = vsinq.f32 %v614_v53  ;;  %vm618_vm3 = vweird.f32 %v2573_v10  ;;  %v762_v34 = vor.u32 %v761_v30, %v760_v29 }
 0x18d   : > { %v519_v15 = vxor.u32 2147483648, %v2396_v57  ;;  %2401 = vrsqrt.f32 %v870_v56  ;;  %v696_v61 = vsub.s32 0, %v2790_v21  ;;  %v763_v59 = vshll.u32 %v2449_v35, %v748_v42 }
 0x18e   : > { %v523_v6 = vsel %vm521_vm15, %v522_v60, %v2396_v57  ;;  %vm625_vm4 = vcmp.eq.s32.totalorder %v2777_v5, 2  ;;  %v750_v36 = vshrl.u32 %v2445_v26, %v749_v54  ;;  %vm769_vm5 = vcmp.lt.s32.totalorder %v747_v19, 4 }
 0x18f   : > { %v520_v17 = vsel %vm518_vm14, %v2394_v49, %v519_v15  ;;  %v782_v27 = vshll.u32 %v742_v4, 8  ;;  %v2090_v38 = vmin.u32 %v696_v61, %v2790_v21  ;;  %v765_v12 = vor.u32 %v764_v47, %v763_v59 }
 0x190   : > { %v524_v13 = vsel %vm517_vm13, %v520_v17, %v523_v6  ;;  %vm766_vm6 = vcmp.lt.s32.totalorder %v747_v19, 1  ;;  %v771_v2 = vsel %vm769_vm5, %v759_v18, 2102212464  ;;  %vm767_vm7 = vcmp.lt.s32.totalorder %v747_v19, 2 }
 0x191   : > { %v525_v52 = vsel %vm514_vm12, nan, %v524_v13  ;;  %v774_v14 = vsel %vm766_vm6, %v753_v23, %v756_v32  ;;  %v775_v41 = vsel %vm769_vm5, %v762_v34, 920167782  ;;  %v698_v58 = vclz %v2090_v38 }
 0x192   : > { %v895_v11 = vand.u32 4294901760, %v525_v52  ;;  %vm768_vm8 = vcmp.lt.s32.totalorder %v747_v19, 3  ;;  %v770_v42 = vsel %vm766_vm6, %v750_v36, %v753_v23  ;;  %v778_v50 = vsel %vm766_vm6, %v756_v32, %v759_v18 }
 0x193   : > { %v772_v49 = vsel %vm768_vm8, %v756_v32, %v771_v2  ;;  %v776_v53 = vsel %vm768_vm8, %v759_v18, %v775_v41  ;;  %v2091_v57 = vadd.s32 4294967294, %v698_v58  ;;  %v779_v15 = vsel %vm769_vm5, %v765_v12, 1326507024  ;;  %v1928_v18 = vld [vmem:[%s3265_s5] sm:$0x7] }
 0x194   : > { %v777_v60 = vsel %vm767_vm7, %v774_v14, %v776_v53  ;;  %v780_v6 = vsel %vm768_vm8, %v762_v34, %v779_v15  ;;  %v686_v17 = vadd.s32 %v2736_v22, %v2751_v0  ;;  %v773_v23 = vsel %vm767_vm7, %v770_v42, %v772_v49  ;;  %v2114_v22 = vld [vmem:[%s311_s10] ss:$0 sm:$0xff]  ;;  %v863_v15 = vpop.xlane.xlu0 %862 }
 0x195   : > { %v2398_v39 = vpop.eup %2397  ;;  %v2813_v8 = vmul.u32.u64.low %v782_v27, %v777_v60  ;;  %v2814_v55 = vmul.u32.u64.high %v782_v27, %v777_v60, %v2813_v8  ;;  %vm2092_vm9 = vcmp.lt.s32.totalorder %v2091_v57, 0  ;;  %v781_v62 = vsel %vm767_vm7, %v778_v50, %v780_v6 }
 0x196   : > { %v2400_v43 = vpop.eup %2399  ;;  %v626_v44 = vxor.u32 2147483648, %v2398_v39  ;;  %v701_v13 = vsel %vm2092_vm9, 0, %v2091_v57  ;;  %v2828_v20 = vmul.u32.u64.low %v782_v27, %v781_v62  ;;  %v2829_v24 = vmul.u32.u64.high %v782_v27, %v781_v62, %v2828_v20 }
 0x197   : > { %v623_v1 = vxor.u32 2147483648, %v2400_v43  ;;  %v2402_v54 = vpop.eup %2401  ;;  %v702_v5 = vsub.s32 32, %v701_v13  ;;  %v706_v30 = vsub.s32 4294967266, %v701_v13  ;;  %v703_v0 = vshll.u32 %v2790_v21, %v701_v13 }
 0x198   : > { %v627_v56 = vsel %vm625_vm4, %v626_v44, %v2400_v43  ;;  %v792_v32 = vadd.s32 1, %v2814_v55  ;;  %v2837_v10 = vsub.f32 %v525_v52, %v895_v11  ;;  %v878_v47 = vmul.f32 %v2402_v54, %v2542_v45 }
 0x199   : > { %v624_v4 = vsel %vm622_vm2, %v2398_v39, %v623_v1  ;;  %v704_v61 = vshrl.u32 %v686_v17, %v702_v5  ;;  %v707_v34 = vadd.s32 127, %v706_v30  ;;  %v789_v38 = vmul.u32 %v782_v27, %v773_v23  ;;  %v869_v5 = vpop.xlane.xlu1 %868 }
 0x19a   : > { %v628_v9 = vsel %vm621_vm0, %v624_v4, %v627_v56  ;;  %vm791_vm10 = vc.u32 %v2829_v24, %v2813_v8  ;;  %v883_v19 = vsel %vm857_vm1, %v878_v47, 0  ;;  %v2847_v12 = vmul.f32 %v2114_v22, %v1928_v18 }
 0x19b   : > { %v629_v7 = vsel %vm618_vm3, nan, %v628_v9  ;;  %v705_v21 = vor.u32 %v704_v61, %v703_v0  ;;  %v708_v2 = vshll.u32 %v707_v34, 23  ;;  %v793_v52 = vsel %vm791_vm10, %v792_v32, %v2814_v55 }
 0x19c   : > { %v898_v29 = vand.u32 4294901760, %v629_v7  ;;  %v794_v39 = vadd.s32 %v793_v52, %v789_v38  ;;  %v2854_v27 = vand.u32 4294901760, %v883_v19  ;;  %v1937_v58 = vmul.f32 %v2847_v12, %v2847_v12 }
 0x19d   : > { %v712_v44 = vcvt.s32.f32 %v705_v21  ;;  %vm1938_vm11 = vcmask 256000   ;;  %vm632_vm12 = vcmp.lt.s32.totalorder %v2636_v3, 0  ;;  %vm2874_vm13 = vcmp.le.f32.partialorder %v630_v25, 0.7853982 }
 0x19e   : > { %v2840_v59 = vpack.c.bf16 %v898_v29, %v895_v11  ;;  %v2842_v36 = vsub.f32 %v629_v7, %v898_v29  ;;  %v709_v11 = vor.u32 4788187, %v708_v2  ;;  %v795_v14 = vadd.s32 536870912, %v794_v39  ;;  %v866_v7 = vpop.xlane.xlu0 %865 }
 0x19f   : > { %v2857_v41 = vsub.f32 %v883_v19, %v2854_v27  ;;  %v1939_v54 = vsel %vm1938_vm11, %v1937_v58, 0.0  ;;  %v871_v20 = vadd.f32 1e-08, %v863_v15  ;;  %v716_v18 = vsub.s32 4, %v2779_v16 }
 0x1a0   : > { %2262 = vmatprep.subr.bf16.mxu1 %v2840_v59  ;;  %v2277_v45 = vpack.c.bf16 %v2842_v36, %v2837_v10  ;;  %v710_v43 = vand.u32 2147483647, %v709_v11  ;;  %v2861_v42 = vshrl.u32 %v795_v14, 30  ;;  %1940 = vadd.xlane.f32.xlu0 %v1939_v54  ;;  %v872_v29 = vadd.f32 1e-08, %v866_v7 }
 0x1a1   : > { %2264 = vmatpush3.bf16.msra.mxu1 %v2840_v59  ;;  %v965_v1 = vand.u32 4294901760, %v2857_v41  ;;  %2205 = vmatprep.mubr.f32.mxu0 %v2857_v41  ;;  %v790_v25 = vadd.s32 %v2813_v8, %v2829_v24  ;;  %v717_v0 = vsel %vm632_vm12, %v716_v18, %v2779_v16  ;;  %v873_v32 = vadd.f32 1e-08, %v869_v5 }
 0x1a2   : > { %2278 = vmatprep.subr.bf16.mxu0 %v2277_v45  ;;  %v713_v49 = vmul.f32 %v712_v44, %v710_v43  ;;  %v797_v53 = vshll.u32 %v2861_v42, 30  ;;  %v719_v38 = vsel %vm2874_vm13, 0, %v717_v0  ;;  %v820_v16 = vsub.s32 4, %v2861_v42 }
 0x1a3   : > { %2280 = vmatpush3.bf16.msra.mxu0 %v2277_v45  ;;  %v966_v50 = vsub.f32 %v2857_v41, %v965_v1  ;;  %v723_v8 = vadd.s32 3, %v719_v38  ;;  %vm736_vm15 = vcmp.lt.s32.totalorder %v2667_v51, 0  ;;  %vm2894_vm0 = vcmp.le.f32.partialorder %v734_v63, 0.7853982 }
 0x1a4   : > { %v714_v56 = vxor.u32 2147483648, %v713_v49  ;;  %v798_v57 = vsub.s32 %v794_v39, %v797_v53  ;;  %vm722_vm5 = vweird.f32 %v2636_v3  ;;  %vm826_vm9 = vweird.f32 %v2667_v51 }
 0x1a5   : > { %v967_v60 = vand.u32 4294901760, %v966_v50  ;;  %v724_v43 = vand.u32 3, %v723_v8 }
 0x1a6   : > { %v800_v4 = vsub.s32 0, %v798_v57  ;;  %v715_v6 = vsel %vm632_vm12, %v714_v56, %v713_v49 }
 0x1a7   : > { %2177 = vmatprep.mubr.f32.mxu1 %v967_v60  ;;  %v718_v62 = vsel %vm2874_vm13, %v2636_v3, %v715_v6  ;;  %vm726_vm2 = vcmp.eq.s32.totalorder %v724_v43, 0  ;;  %vm729_vm3 = vcmp.eq.s32.totalorder %v724_v43, 2  ;;  %vm725_vm4 = vcmp.lt.s32.totalorder %v724_v43, 2 }
 0x1a8   : > { %v2094_v55 = vmin.u32 %v800_v4, %v798_v57  ;;  %2403 = vcosq.f32 %v718_v62 }
 0x1a9   : > { %2405 = vsinq.f32 %v718_v62 }
 0x1aa   : > { %v802_v17 = vclz %v2094_v55  ;;  %2407 = vrsqrt.f32 %v871_v20 }
 0x1ab   : > { %2409 = vrsqrt.f32 %v872_v29  ;;  %v1013_v29 = vand.u32 4294901760, %v2842_v36 }
 0x1ac   : > { %v2095_v13 = vadd.s32 4294967294, %v802_v17  ;;  %2411 = vrsqrt.f32 %v873_v32 }
 0x1ae   : > { %vm2096_vm14 = vcmp.lt.s32.totalorder %v2095_v13, 0 }
 0x1af   : > { %v805_v30 = vsel %vm2096_vm14, 0, %v2095_v13 }
 0x1b0   : > { %v806_v23 = vsub.s32 32, %v805_v30  ;;  %v810_v22 = vsub.s32 4294967266, %v805_v30  ;;  %v807_v47 = vshll.u32 %v798_v57, %v805_v30  ;;  %v821_v57 = vsel %vm736_vm15, %v820_v16, %v2861_v42 }
 0x1b1   : > { %v823_v63 = vsel %vm2894_vm0, 0, %v821_v57 }
 0x1b2   : > { %v808_v61 = vshrl.u32 %v790_v25, %v806_v23  ;;  %v811_v34 = vadd.s32 127, %v810_v22  ;;  %v2404_v24 = vpop.eup %2403  ;;  %v827_v62 = vadd.s32 3, %v823_v63  ;;  %v1006_v23 = vand.u32 4294901760, %v2837_v10 }
 0x1b3   : > { %v2406_v39 = vpop.eup %2405  ;;  %v730_v49 = vxor.u32 2147483648, %v2404_v24 }
 0x1b4   : > { %v809_v19 = vor.u32 %v808_v61, %v807_v47  ;;  %v812_v21 = vshll.u32 %v811_v34, 23  ;;  %v2408_v11 = vpop.eup %2407  ;;  %v727_v58 = vxor.u32 2147483648, %v2406_v39  ;;  %v828_v18 = vand.u32 3, %v827_v62 }
 0x1b5   : > { %v2410_v44 = vpop.eup %2409  ;;  %v879_v50 = vmul.f32 %v2408_v11, %v2526_v37  ;;  %v731_v37 = vsel %vm729_vm3, %v730_v49, %v2406_v39  ;;  %v1014_v47 = vsub.f32 %v2842_v36, %v1013_v29  ;;  %v2293_v63 = vpack.c.bf16 %v1013_v29, %v1006_v23 }
 0x1b6   : > { %v813_v2 = vor.u32 4788187, %v812_v21  ;;  %v816_v45 = vcvt.s32.f32 %v809_v19  ;;  %v2412_v60 = vpop.eup %2411  ;;  %v880_v4 = vmul.f32 %v2410_v44, %v2533_v40  ;;  %v728_v6 = vsel %vm726_vm2, %v2404_v24, %v727_v58 }
 0x1b7   : > { %v886_v55 = vsel %vm857_vm1, %v879_v50, 0  ;;  %v881_v42 = vmul.f32 %v2412_v60, %v2549_v48  ;;  %v732_v9 = vsel %vm725_vm4, %v728_v6, %v731_v37  ;;  %vm833_vm6 = vcmp.eq.s32.totalorder %v828_v18, 2 }
 0x1b8   : > { %v814_v52 = vand.u32 2147483647, %v813_v2  ;;  %v889_v17 = vsel %vm857_vm1, %v880_v4, 0  ;;  %v2908_v7 = vand.u32 4294901760, %v886_v55  ;;  %v733_v40 = vsel %vm722_vm5, nan, %v732_v9 }
 0x1b9   : > { %v2911_v13 = vand.u32 4294901760, %v889_v17  ;;  %v892_v20 = vsel %vm857_vm1, %v881_v42, 0  ;;  %v901_v48 = vand.u32 4294901760, %v733_v40  ;;  %vm830_vm7 = vcmp.eq.s32.totalorder %v828_v18, 0 }
 0x1ba   : > { %v817_v14 = vmul.f32 %v816_v45, %v814_v52  ;;  %v2916_v5 = vsub.f32 %v886_v55, %v2908_v7  ;;  %v2918_v30 = vand.u32 4294901760, %v892_v20  ;;  %vm829_vm8 = vcmp.lt.s32.totalorder %v828_v18, 2 }
 0x1bb   : > { %v2922_v22 = vsub.f32 %v889_v17, %v2911_v13  ;;  %v1019_v38 = vsub.f32 %v733_v40, %v901_v48  ;;  %v1007_v2 = vsub.f32 %v2837_v10, %v1006_v23  ;;  %v1015_v45 = vand.u32 4294901760, %v1014_v47 }
 0x1bc   : > { %v818_v53 = vxor.u32 2147483648, %v817_v14  ;;  %v975_v61 = vand.u32 4294901760, %v2916_v5  ;;  %v994_v19 = vsub.f32 %v892_v20, %v2918_v30  ;;  %v2451_v9 = vmov 0.0  }
 0x1bd   : > { %v985_v8 = vand.u32 4294901760, %v2922_v22  ;;  %v1020_v16 = vand.u32 4294901760, %v1019_v38  ;;  %v1008_v43 = vand.u32 4294901760, %v1007_v2 }
 0x1be   : > { %v819_v56 = vsel %vm736_vm15, %v818_v53, %v817_v14  ;;  %v976_v39 = vsub.f32 %v2916_v5, %v975_v61  ;;  %v995_v14 = vand.u32 4294901760, %v994_v19 }
 0x1bf   : > { %v822_v15 = vsel %vm2894_vm0, %v2667_v51, %v819_v56  ;;  %v986_v44 = vsub.f32 %v2922_v22, %v985_v8  ;;  %v2269_v53 = vpack.c.bf16 %v1015_v45, %v1008_v43  ;;  %v1021_v56 = vsub.f32 %v1019_v38, %v1020_v16 }
 0x1c0   : > { %2413 = vcosq.f32 %v822_v15  ;;  %v977_v50 = vand.u32 4294901760, %v976_v39  ;;  %v996_v54 = vsub.f32 %v994_v19, %v995_v14 }
 0x1c1   : > { %2415 = vsinq.f32 %v822_v15  ;;  %v987_v57 = vand.u32 4294901760, %v986_v44  ;;  %v1022_v4 = vand.u32 4294901760, %v1021_v56 }
 0x1c2   : > { %v997_v15 = vand.u32 4294901760, %v996_v54 }
 0x1ca   : > { %v2414_v25 = vpop.eup %2413 }
 0x1cb   : > { %v2416_v3 = vpop.eup %2415  ;;  %v834_v0 = vxor.u32 2147483648, %v2414_v25 }
 0x1cc   : > { %v831_v32 = vxor.u32 2147483648, %v2416_v3 }
 0x1cd   : > { %v835_v34 = vsel %vm833_vm6, %v834_v0, %v2416_v3 }
 0x1ce   : > { %v832_v21 = vsel %vm830_vm7, %v2414_v25, %v831_v32 }
 0x1cf   : > { %v836_v24 = vsel %vm829_vm8, %v832_v21, %v835_v34 }
 0x1d0   : > { %v837_v52 = vsel %vm826_vm9, nan, %v836_v24 }
 0x1d1   : > { %v904_v11 = vand.u32 4294901760, %v837_v52 }
 0x1d3   : > { %v2265_v58 = vpack.c.bf16 %v904_v11, %v901_v48  ;;  %v1026_v49 = vsub.f32 %v837_v52, %v904_v11 }
 0x1d5   : > { %2266 = vmatprep.subr.bf16.mxu1 %v2265_v58  ;;  %v2281_v10 = vpack.c.bf16 %v1026_v49, %v1019_v38  ;;  %v1027_v51 = vand.u32 4294901760, %v1026_v49 }
 0x1d6   : > { %2268 = vmatpush3.bf16.msra.mxu1 %v2265_v58 }
 0x1d7   : > { %2270 = vmatprep.subr.bf16.mxu1 %v2269_v53  ;;  %2282 = vmatprep.subr.bf16.mxu0 %v2281_v10  ;;  %v1028_v60 = vsub.f32 %v1026_v49, %v1027_v51  ;;  %v2297_v55 = vpack.c.bf16 %v1027_v51, %v1020_v16 }
 0x1d8   : > { %2284 = vmatpush3.bf16.msra.mxu0 %v2281_v10 }
 0x1d9   : > { %2178 = vmatmul.mubr.f32.vlgmr.msra.gmra.mrb[0].mxu1 %v977_v50  ;;  %2286 = vmatprep.subr.bf16.mxu0 %v2840_v59  ;;  %v1029_v6 = vand.u32 4294901760, %v1028_v60 }
 0x1da   : > { %2272 = vmatpush3.bf16.msra.mxu1 %v2269_v53  ;;  %2180 = vmatprep.mubr.f32.mxu1 %v987_v57 }
 0x1db   : > { %2206 = vmatmul.mubr.f32.vlgmr.msra.gmra.mrb[0].mxu0 %v2916_v5  ;;  %v2273_v37 = vpack.c.bf16 %v1029_v6, %v1022_v4 }
 0x1dc   : > { %2208 = vmatprep.mubr.f32.mxu0 %v2922_v22  ;;  %2288 = vmatpush3.bf16.msra.mxu0 %v2840_v59 }
 0x1dd   : > { %2181 = vmatmul.mubr.f32.gmra.mrb[2].mxu1 %v997_v15  ;;  %2274 = vmatprep.subr.bf16.mxu1 %v2273_v37 }
 0x1de   : > { %2290 = vmatprep.subr.bf16.mxu0 %v2265_v58  ;;  %2276 = vmatpush3.bf16.msra.mxu1 %v2273_v37 }
 0x1df   : > { %2191 = vmatprep.mubr.f32.mxu1 %v2854_v27  ;;  %2209 = vmatmul.mubr.f32.gmra.mrb[2].mxu0 %v994_v19 }
 0x1e0   : > { %2292 = vmatpush3.bf16.msra.mxu0 %v2265_v58  ;;  %2219 = vmatprep.mubr.f32.mxu0 %v965_v1 }
 0x1e1   : > { %2192 = vmatmul.mubr.f32.vlgmr.msra.gmra.mrb[0].mxu1 %v2908_v7  ;;  %2294 = vmatprep.subr.bf16.mxu0 %v2293_v63 }
 0x1e2   : > { %2194 = vmatprep.mubr.f32.mxu1 %v2911_v13  ;;  %2253 = vmatprep.subr.bf16.mxu1 %v2451_v9 }
 0x1e3   : > { %2220 = vmatmul.mubr.f32.vlgmr.msra.gmra.mrb[0].mxu0 %v975_v61 }
 0x1e4   : > { %2222 = vmatprep.mubr.f32.mxu0 %v985_v8  ;;  %2296 = vmatpush3.bf16.msra.mxu0 %v2293_v63 }
 0x1e5   : > { %2195 = vmatmul.mubr.f32.gmra.mrb[2].mxu1 %v2918_v30  ;;  %2298 = vmatprep.subr.bf16.mxu0 %v2297_v55 }
 0x1e7   : > { %2223 = vmatmul.mubr.f32.gmra.mrb[2].mxu0 %v995_v14 }
 0x1e8   : > { %2300 = vmatpush3.bf16.msra.mxu0 %v2297_v55  ;;  %2233 = vmatprep.mubr.f32.mxu0 %v2854_v27 }
 0x1e9   : > { %2302 = vmatprep.subr.bf16.mxu0 %v2840_v59 }
 0x1eb   : > { %2234 = vmatmul.mubr.f32.vlgmr.msra.gmra.mrb[0].mxu0 %v2908_v7 }
 0x1ec   : > { %2236 = vmatprep.mubr.f32.mxu0 %v2911_v13  ;;  %2304 = vmatpush3.bf16.msra.mxu0 %v2840_v59 }
 0x1ed   : > { %2306 = vmatprep.subr.bf16.mxu0 %v2265_v58 }
 0x1ef   : > { %2237 = vmatmul.mubr.f32.gmra.mrb[2].mxu0 %v2918_v30 }
 0x1f0   : > { %2308 = vmatpush3.bf16.msra.mxu0 %v2265_v58  ;;  %2247 = vmatprep.mubr.f32.mxu0 %v2854_v27 }
 0x1f3   : > { %2248 = vmatmul.mubr.f32.vlgmr.msra.gmra.mrb[0].mxu0 %v2908_v7 }
 0x1f4   : > { %2250 = vmatprep.mubr.f32.mxu0 %v2911_v13 }
 0x1f7   : > { %2251 = vmatmul.mubr.f32.gmra.mrb[2].mxu0 %v2918_v30 }
 0x2b4   : > { %v2193_v36 = vpop.f32.mrb[0].mxu1 }
 0x2b5   : > { %v1090_v41 = vpop.f32.mrb[1].mxu1 }
 0x2b8   : > { %v2196_v1 = vpop.f32.mrb[2].mxu1 }
 0x2b9   : > { %v1102_v42 = vpop.f32.mrb[3].mxu1 }
 0x2c6   : > { %v2249_v59 = vpop.f32.mrb[0].mxu0 }
 0x2c7   : > { %v2309_v17 = vadd.f32 %v2249_v59, %v2193_v36  ;;  %v1486_v62 = vpop.f32.mrb[1].mxu0 }
 0x2c8   : > { %v2310_v40 = vadd.f32 %v1486_v62, %v1090_v41 }
 0x2c9   : > { %v2957_v20 = vmul.f32 30.0, %v2309_v17 }
 0x2ca   : > { %v2959_v27 = vmul.f32 30.0, %v2310_v40  ;;  %v2252_v7 = vpop.f32.mrb[2].mxu0 }
 0x2cb   : > { %v1616_v13 = vand.u32 2147483647, %v2957_v20  ;;  %v1619_v18 = vand.u32 2139095040, %v2957_v20  ;;  %v2311_v29 = vadd.f32 %v2252_v7, %v2196_v1  ;;  %v1498_v5 = vpop.f32.mrb[3].mxu0  ;;  %vm1618_vm8 = vcmp.lt.s32.totalorder %v2957_v20, 0 }
 0x2cc   : > { %v1512_v48 = vand.u32 2147483647, %v2959_v27  ;;  %v1515_v30 = vand.u32 2139095040, %v2959_v27  ;;  %v2312_v25 = vadd.f32 %v1498_v5, %v1102_v42 }
 0x2cd   : > { %v1620_v23 = vshrl.u32 %v1619_v18, 23  ;;  %v1623_v22 = vand.u32 8388607, %v1616_v13  ;;  %v2967_v3 = vmul.f32 30.0, %v2311_v29 }
 0x2ce   : > { %v1516_v0 = vshrl.u32 %v1515_v30, 23  ;;  %v1519_v32 = vand.u32 8388607, %v1512_v48  ;;  %v2973_v2 = vmul.f32 30.0, %v2312_v25 }
 0x2cf   : > { %v2102_v47 = vadd.s32 4294967169, %v1620_v23  ;;  %v1824_v61 = vand.u32 2147483647, %v2967_v3  ;;  %v1827_v38 = vand.u32 2139095040, %v2967_v3  ;;  %v1624_v19 = vor.u32 8388608, %v1623_v22 }
 0x2d0   : > { %v2098_v34 = vadd.s32 4294967169, %v1516_v0  ;;  %v1520_v8 = vor.u32 8388608, %v1519_v32  ;;  %v1720_v44 = vand.u32 2147483647, %v2973_v2 }
 0x2d1   : > { %v1626_v21 = vadd.s32 1, %v2102_v47  ;;  %v1828_v52 = vshrl.u32 %v1827_v38, 23  ;;  %v2977_v45 = vand.u32 8388607, %v1824_v61  ;;  %v2980_v58 = vshll.u32 %v1624_v19, 8 }
 0x2d2   : > { %v1522_v24 = vadd.s32 1, %v2098_v34  ;;  %v2984_v53 = vshll.u32 %v1520_v8, 8 }
 0x2d3   : > { %vm1627_vm10 = vcmp.gt.s32.totalorder %v1626_v21, 0  ;;  %v2110_v11 = vadd.s32 4294967169, %v1828_v52  ;;  %v1832_v50 = vor.u32 8388608, %v2977_v45 }
 0x2d4   : > { %v1628_v39 = vsel %vm1627_vm10, %v1626_v21, 0  ;;  %vm1523_vm11 = vcmp.gt.s32.totalorder %v1522_v24, 0 }
 0x2d5   : > { %v1629_v14 = vshrl.u32 %v1628_v39, 5  ;;  %v1630_v16 = vand.u32 31, %v1628_v39  ;;  %v1524_v43 = vsel %vm1523_vm11, %v1522_v24, 0  ;;  %v2988_v51 = vadd.s32 1, %v2110_v11 }
 0x2d6   : > { %v2982_v49 = vshrl.u32 %v1524_v43, 5  ;;  %v1526_v56 = vand.u32 31, %v1524_v43 }
 0x2d7   : > { %v1631_v10 = vsub.s32 32, %v1630_v16  ;;  %v1633_v54 = vshll.u32 %v2445_v26, %v1630_v16  ;;  %v1636_v57 = vshll.u32 %v2446_v28, %v1630_v16  ;;  %v1639_v60 = vshll.u32 %v2447_v31, %v1630_v16 }
 0x2d8   : > { %v1642_v15 = vshll.u32 %v2448_v33, %v1630_v16  ;;  %v1645_v4 = vshll.u32 %v2449_v35, %v1630_v16  ;;  %vm1648_vm12 = vcmp.lt.s32.totalorder %v1629_v14, 1  ;;  %vm1649_vm13 = vcmp.lt.s32.totalorder %v1629_v14, 2 }
 0x2d9   : > { %v1634_v6 = vshrl.u32 %v2446_v28, %v1631_v10  ;;  %v1637_v37 = vshrl.u32 %v2447_v31, %v1631_v10  ;;  %v1640_v63 = vshrl.u32 %v2448_v33, %v1631_v10  ;;  %v1632_v55 = vshrl.u32 %v2445_v26, %v1631_v10 }
 0x2da   : > { %v1643_v36 = vshrl.u32 %v2449_v35, %v1631_v10  ;;  %v1646_v41 = vshrl.u32 %v2450_v46, %v1631_v10  ;;  %v1527_v17 = vsub.s32 32, %v1526_v56  ;;  %vm1650_vm14 = vcmp.lt.s32.totalorder %v1629_v14, 3 }
 0x2db   : > { %v1635_v1 = vor.u32 %v1634_v6, %v1633_v54  ;;  %v1638_v42 = vor.u32 %v1637_v37, %v1636_v57  ;;  %v1641_v59 = vor.u32 %v1640_v63, %v1639_v60  ;;  %vm1651_vm15 = vcmp.lt.s32.totalorder %v1629_v14, 4 }
 0x2dc   : > { %v1644_v62 = vor.u32 %v1643_v36, %v1642_v15  ;;  %v1647_v40 = vor.u32 %v1646_v41, %v1645_v4  ;;  %v1529_v22 = vshll.u32 %v2445_v26, %v1526_v56  ;;  %v1530_v47 = vshrl.u32 %v2446_v28, %v1527_v17 }
 0x2dd   : > { %v1652_v7 = vsel %vm1648_vm12, %v1632_v55, %v1635_v1  ;;  %v1653_v18 = vsel %vm1651_vm15, %v1641_v59, 2102212464  ;;  %v1656_v29 = vsel %vm1648_vm12, %v1635_v1, %v1638_v42  ;;  %v1660_v5 = vsel %vm1648_vm12, %v1638_v42, %v1641_v59 }
 0x2de   : > { %v1654_v30 = vsel %vm1650_vm14, %v1638_v42, %v1653_v18  ;;  %v1657_v25 = vsel %vm1651_vm15, %v1644_v62, 920167782  ;;  %v1661_v23 = vsel %vm1651_vm15, %v1647_v40, 1326507024  ;;  %v1532_v34 = vshll.u32 %v2446_v28, %v1526_v56 }
 0x2df   : > { %v1658_v0 = vsel %vm1650_vm14, %v1641_v59, %v1657_v25  ;;  %v1662_v32 = vsel %vm1650_vm14, %v1644_v62, %v1661_v23  ;;  %v1655_v38 = vsel %vm1649_vm13, %v1652_v7, %v1654_v30  ;;  %v1533_v8 = vshrl.u32 %v2447_v31, %v1527_v17 }
 0x2e0   : > { %v1659_v19 = vsel %vm1649_vm13, %v1656_v29, %v1658_v0  ;;  %v1663_v21 = vsel %vm1649_vm13, %v1660_v5, %v1662_v32  ;;  %v1531_v16 = vor.u32 %v1530_v47, %v1529_v22  ;;  %v1535_v10 = vshll.u32 %v2447_v31, %v1526_v56 }
 0x2e1   : > { %v3011_v24 = vmul.u32.u64.low %v2980_v58, %v1663_v21  ;;  %v3012_v52 = vmul.u32.u64.high %v2980_v58, %v1663_v21, %v3011_v24  ;;  %v3015_v39 = vmul.u32.u64.low %v2980_v58, %v1659_v19  ;;  %v3016_v11 = vmul.u32.u64.high %v2980_v58, %v1659_v19, %v3015_v39 }
 0x2e2   : > { %v1534_v43 = vor.u32 %v1533_v8, %v1532_v34  ;;  %v1536_v54 = vshrl.u32 %v2448_v33, %v1527_v17  ;;  %v1528_v57 = vshrl.u32 %v2445_v26, %v1527_v17  ;;  %v1538_v14 = vshll.u32 %v2448_v33, %v1526_v56 }
 0x2e3   : > { %v1539_v60 = vshrl.u32 %v2449_v35, %v1527_v17  ;;  %v1542_v15 = vshrl.u32 %v2450_v46, %v1527_v17  ;;  %v1671_v4 = vmul.u32 %v2980_v58, %v1655_v38  ;;  %v1541_v37 = vshll.u32 %v2449_v35, %v1526_v56 }
 0x2e4   : > { %v1537_v6 = vor.u32 %v1536_v54, %v1535_v10  ;;  %vm1544_vm0 = vcmp.lt.s32.totalorder %v2982_v49, 1  ;;  %vm1673_vm2 = vc.u32 %v3012_v52, %v3015_v39  ;;  %v1674_v63 = vadd.s32 1, %v3016_v11 }
 0x2e5   : > { %v1540_v55 = vor.u32 %v1539_v60, %v1538_v14  ;;  %vm1545_vm3 = vcmp.lt.s32.totalorder %v2982_v49, 2  ;;  %v1543_v36 = vor.u32 %v1542_v15, %v1541_v37  ;;  %vm1546_vm4 = vcmp.lt.s32.totalorder %v2982_v49, 3 }
 0x2e6   : > { %vm1547_vm5 = vcmp.lt.s32.totalorder %v2982_v49, 4  ;;  %v1552_v41 = vsel %vm1544_vm0, %v1531_v16, %v1534_v43  ;;  %v1675_v58 = vsel %vm1673_vm2, %v1674_v63, %v3016_v11  ;;  %v1556_v56 = vsel %vm1544_vm0, %v1534_v43, %v1537_v6 }
 0x2e7   : > { %v1549_v1 = vsel %vm1547_vm5, %v1537_v6, 2102212464  ;;  %v1553_v42 = vsel %vm1547_vm5, %v1540_v55, 920167782  ;;  %v1676_v59 = vadd.s32 %v1675_v58, %v1671_v4  ;;  %v1548_v17 = vsel %vm1544_vm0, %v1528_v57, %v1531_v16 }
 0x2e8   : > { %v1554_v62 = vsel %vm1546_vm4, %v1537_v6, %v1553_v42  ;;  %v1557_v40 = vsel %vm1547_vm5, %v1543_v36, 1326507024  ;;  %v1550_v7 = vsel %vm1546_vm4, %v1534_v43, %v1549_v1  ;;  %vm1835_vm6 = vcmp.gt.s32.totalorder %v2988_v51, 0 }
 0x2e9   : > { %v1555_v18 = vsel %vm1545_vm3, %v1552_v41, %v1554_v62  ;;  %v1558_v29 = vsel %vm1546_vm4, %v1540_v55, %v1557_v40  ;;  %v1677_v5 = vadd.s32 536870912, %v1676_v59  ;;  %v1836_v32 = vsel %vm1835_vm6, %v2988_v51, 0 }
 0x2ea   : > { %v1559_v30 = vsel %vm1545_vm3, %v1556_v56, %v1558_v29  ;;  %v3039_v25 = vmul.u32.u64.low %v2984_v53, %v1555_v18  ;;  %v3040_v23 = vmul.u32.u64.high %v2984_v53, %v1555_v18, %v3039_v25  ;;  %v1723_v47 = vand.u32 2139095040, %v2973_v2 }
 0x2eb   : > { %v3044_v22 = vmul.u32.u64.low %v2984_v53, %v1559_v30  ;;  %v3045_v0 = vmul.u32.u64.high %v2984_v53, %v1559_v30, %v3044_v22  ;;  %v1678_v34 = vshrl.u32 %v1677_v5, 30  ;;  %v1551_v38 = vsel %vm1545_vm3, %v1548_v17, %v1550_v7 }
 0x2ec   : > { %v1838_v19 = vand.u32 31, %v1836_v32  ;;  %v1570_v8 = vadd.s32 1, %v3040_v23  ;;  %v3054_v11 = vand.u32 8388607, %v1720_v44  ;;  %v1567_v16 = vmul.u32 %v2984_v53, %v1551_v38 }
 0x2ed   : > { %v1679_v21 = vshll.u32 %v1678_v34, 30  ;;  %vm1569_vm7 = vc.u32 %v3045_v0, %v3039_v25  ;;  %v3061_v51 = vshll.u32 %v1832_v50, 8  ;;  %v1724_v49 = vshrl.u32 %v1723_v47, 23 }
 0x2ee   : > { %v1839_v24 = vsub.s32 32, %v1838_v19  ;;  %v1672_v43 = vadd.s32 %v3015_v39, %v3012_v52  ;;  %v1571_v54 = vsel %vm1569_vm7, %v1570_v8, %v3040_v23  ;;  %v1837_v57 = vshrl.u32 %v1836_v32, 5 }
 0x2ef   : > { %v3065_v10 = vsub.s32 %v1676_v59, %v1679_v21  ;;  %v1572_v14 = vadd.s32 %v1571_v54, %v1567_v16  ;;  %v1841_v53 = vshll.u32 %v2445_v26, %v1838_v19  ;;  %v1844_v50 = vshll.u32 %v2446_v28, %v1838_v19 }
 0x2f0   : > { %v1842_v60 = vshrl.u32 %v2446_v28, %v1839_v24  ;;  %v1845_v15 = vshrl.u32 %v2447_v31, %v1839_v24  ;;  %v1847_v4 = vshll.u32 %v2447_v31, %v1838_v19  ;;  %v1848_v52 = vshrl.u32 %v2448_v33, %v1839_v24 }
 0x2f1   : > { %v1682_v45 = vsub.s32 0, %v3065_v10  ;;  %v1573_v39 = vadd.s32 536870912, %v1572_v14  ;;  %v1850_v37 = vshll.u32 %v2448_v33, %v1838_v19  ;;  %v1851_v63 = vshrl.u32 %v2449_v35, %v1839_v24 }
 0x2f2   : > { %v1843_v6 = vor.u32 %v1842_v60, %v1841_v53  ;;  %v1846_v36 = vor.u32 %v1845_v15, %v1844_v50  ;;  %v1849_v41 = vor.u32 %v1848_v52, %v1847_v4  ;;  %v1854_v58 = vshrl.u32 %v2450_v46, %v1839_v24 }
 0x2f3   : > { %v2103_v55 = vmin.u32 %v1682_v45, %v3065_v10  ;;  %v1702_v1 = vsub.s32 4, %v1678_v34  ;;  %v1574_v42 = vshrl.u32 %v1573_v39, 30  ;;  %v1852_v56 = vor.u32 %v1851_v63, %v1850_v37 }
 0x2f4   : > { %v1853_v59 = vshll.u32 %v2449_v35, %v1838_v19  ;;  %v1840_v62 = vshrl.u32 %v2445_v26, %v1839_v24  ;;  %vm1856_vm9 = vcmp.lt.s32.totalorder %v1837_v57, 1  ;;  %v2106_v40 = vadd.s32 4294967169, %v1724_v49 }
 0x2f5   : > { %v1684_v17 = vclz %v2103_v55  ;;  %v1575_v7 = vshll.u32 %v1574_v42, 30  ;;  %vm1858_vm10 = vcmp.lt.s32.totalorder %v1837_v57, 3  ;;  %vm1859_vm11 = vcmp.lt.s32.totalorder %v1837_v57, 4 }
 0x2f6   : > { %v1855_v18 = vor.u32 %v1854_v58, %v1853_v59  ;;  %v1861_v5 = vsel %vm1859_vm11, %v1849_v41, 2102212464  ;;  %v1864_v30 = vsel %vm1856_vm9, %v1843_v6, %v1846_v36  ;;  %v1865_v23 = vsel %vm1859_vm11, %v1852_v56, 920167782 }
 0x2f7   : > { %v2104_v29 = vadd.s32 4294967294, %v1684_v17  ;;  %vm3086_vm12 = vcmp.le.f32.partialorder %v1616_v13, 0.7853982  ;;  %v3092_v32 = vsel %vm1618_vm8, %v1702_v1, %v1678_v34  ;;  %v3094_v47 = vsub.s32 %v1572_v14, %v1575_v7 }
 0x2f8   : > { %vm1857_vm13 = vcmp.lt.s32.totalorder %v1837_v57, 2  ;;  %v1866_v38 = vsel %vm1858_vm10, %v1849_v41, %v1865_v23  ;;  %vm1514_vm15 = vcmp.lt.s32.totalorder %v2959_v27, 0  ;;  %v1860_v19 = vsel %vm1856_vm9, %v1840_v62, %v1843_v6 }
 0x2f9   : > { %vm2105_vm14 = vcmp.lt.s32.totalorder %v2104_v29, 0  ;;  %v1867_v21 = vsel %vm1857_vm13, %v1864_v30, %v1866_v38  ;;  %v1868_v13 = vsel %vm1856_vm9, %v1846_v36, %v1849_v41  ;;  %v1578_v24 = vsub.s32 0, %v3094_v47 }
 0x2fa   : > { %v1687_v8 = vsel %vm2105_vm14, 0, %v2104_v29  ;;  %v1862_v34 = vsel %vm1858_vm10, %v1846_v36, %v1861_v5  ;;  %v1869_v16 = vsel %vm1859_vm11, %v1855_v18, 1326507024  ;;  %v1730_v55 = vadd.s32 1, %v2106_v40 }
 0x2fb   : > { %v1688_v49 = vsub.s32 32, %v1687_v8  ;;  %v1689_v54 = vshll.u32 %v3065_v10, %v1687_v8  ;;  %v1692_v14 = vsub.s32 4294967266, %v1687_v8  ;;  %v1870_v53 = vsel %vm1858_vm10, %v1852_v56, %v1869_v16 }
 0x2fc   : > { %v2099_v60 = vmin.u32 %v1578_v24, %v3094_v47  ;;  %v1871_v15 = vsel %vm1857_vm13, %v1868_v13, %v1870_v53  ;;  %v3109_v45 = vmul.u32.u64.low %v3061_v51, %v1867_v21  ;;  %v3110_v50 = vmul.u32.u64.high %v3061_v51, %v1867_v21, %v3109_v45 }
 0x2fd   : > { %v1690_v4 = vshrl.u32 %v1672_v43, %v1688_v49  ;;  %v1693_v52 = vadd.s32 127, %v1692_v14  ;;  %v3114_v39 = vmul.u32.u64.low %v3061_v51, %v1871_v15  ;;  %v3115_v6 = vmul.u32.u64.high %v3061_v51, %v1871_v15, %v3114_v39 }
 0x2fe   : > { %v1580_v37 = vclz %v2099_v60  ;;  %v1598_v10 = vsub.s32 4, %v1574_v42  ;;  %v1863_v63 = vsel %vm1857_vm13, %v1860_v19, %v1862_v34  ;;  %vm3120_vm0 = vcmp.le.f32.partialorder %v1512_v48, 0.7853982 }
 0x2ff   : > { %v1691_v36 = vor.u32 %v1690_v4, %v1689_v54  ;;  %v1694_v41 = vshll.u32 %v1693_v52, 23  ;;  %v1728_v43 = vor.u32 8388608, %v3054_v11  ;;  %v1568_v1 = vadd.s32 %v3039_v25, %v3045_v0 }
 0x300   : > { %v2100_v56 = vadd.s32 4294967294, %v1580_v37  ;;  %v1882_v59 = vadd.s32 1, %v3110_v50  ;;  %vm1731_vm2 = vcmp.gt.s32.totalorder %v1730_v55, 0  ;;  %v1705_v17 = vsel %vm3086_vm12, 0, %v3092_v32 }
 0x301   : > { %v1695_v57 = vor.u32 4788187, %v1694_v41  ;;  %v1879_v62 = vmul.u32 %v3061_v51, %v1863_v63  ;;  %vm1881_vm3 = vc.u32 %v3115_v6, %v3109_v45  ;;  %v3136_v48 = vsel %vm1514_vm15, %v1598_v10, %v1574_v42 }
 0x302   : > { %vm2101_vm4 = vcmp.lt.s32.totalorder %v2100_v56, 0  ;;  %v1883_v25 = vsel %vm1881_vm3, %v1882_v59, %v3110_v50  ;;  %v1732_v0 = vsel %vm1731_vm2, %v1730_v55, 0  ;;  %v1698_v40 = vcvt.s32.f32 %v1691_v36 }
 0x303   : > { %v1696_v11 = vand.u32 2147483647, %v1695_v57  ;;  %v1583_v7 = vsel %vm2101_vm4, 0, %v2100_v56  ;;  %v1884_v18 = vadd.s32 %v1883_v25, %v1879_v62  ;;  %v3139_v30 = vshrl.u32 %v1732_v0, 5 }
 0x304   : > { %v1584_v29 = vsub.s32 32, %v1583_v7  ;;  %v1588_v5 = vsub.s32 4294967266, %v1583_v7  ;;  %v1734_v51 = vand.u32 31, %v1732_v0  ;;  %v1601_v32 = vsel %vm3120_vm0, 0, %v3136_v48 }
 0x305   : > { %v1699_v23 = vmul.f32 %v1698_v40, %v1696_v11  ;;  %v1885_v38 = vadd.s32 536870912, %v1884_v18  ;;  %v1585_v42 = vshll.u32 %v3094_v47, %v1583_v7  ;;  %v3147_v34 = vshll.u32 %v1728_v43, 8 }
 0x306   : > { %v1586_v19 = vshrl.u32 %v1568_v1, %v1584_v29  ;;  %v1589_v21 = vadd.s32 127, %v1588_v5  ;;  %v1735_v13 = vsub.s32 32, %v1734_v51  ;;  %v3149_v16 = vadd.s32 3, %v1705_v17 }
 0x307   : > { %v1700_v8 = vxor.u32 2147483648, %v1699_v23  ;;  %v3145_v24 = vshrl.u32 %v1885_v38, 30  ;;  %vm1752_vm5 = vcmp.lt.s32.totalorder %v3139_v30, 1  ;;  %v1737_v60 = vshll.u32 %v2445_v26, %v1734_v51 }
 0x308   : > { %v1587_v49 = vor.u32 %v1586_v19, %v1585_v42  ;;  %v1590_v54 = vshll.u32 %v1589_v21, 23  ;;  %v1738_v14 = vshrl.u32 %v2446_v28, %v1735_v13  ;;  %v1741_v15 = vshrl.u32 %v2447_v31, %v1735_v13 }
 0x309   : > { %v1701_v53 = vsel %vm1618_vm8, %v1700_v8, %v1699_v23  ;;  %v1887_v47 = vshll.u32 %v3145_v24, 30  ;;  %v1740_v52 = vshll.u32 %v2446_v28, %v1734_v51  ;;  %v1743_v39 = vshll.u32 %v2447_v31, %v1734_v51 }
 0x30a   : > { %v1704_v50 = vsel %vm3086_vm12, %v2957_v20, %v1701_v53  ;;  %v1591_v4 = vor.u32 4788187, %v1590_v54  ;;  %vm1753_vm6 = vcmp.lt.s32.totalorder %v3139_v30, 2  ;;  %v1594_v37 = vcvt.s32.f32 %v1587_v49 }
 0x30b   : > { %2417 = vcosq.f32 %v1704_v50  ;;  %v3164_v10 = vsub.s32 %v1884_v18, %v1887_v47  ;;  %v1739_v63 = vor.u32 %v1738_v14, %v1737_v60  ;;  %v1742_v36 = vor.u32 %v1741_v15, %v1740_v52 }
 0x30c   : > { %2419 = vsinq.f32 %v1704_v50  ;;  %v1592_v55 = vand.u32 2147483647, %v1591_v4  ;;  %v1744_v41 = vshrl.u32 %v2448_v33, %v1735_v13  ;;  %v1736_v43 = vshrl.u32 %v2445_v26, %v1735_v13 }
 0x30d   : > { %v1890_v22 = vsub.s32 0, %v3164_v10  ;;  %v1746_v28 = vshll.u32 %v2448_v33, %v1734_v51  ;;  %v1747_v31 = vshrl.u32 %v2449_v35, %v1735_v13  ;;  %v1749_v59 = vshll.u32 %v2449_v35, %v1734_v51 }
 0x30e   : > { %v1595_v1 = vmul.f32 %v1594_v37, %v1592_v55  ;;  %v1745_v56 = vor.u32 %v1744_v41, %v1743_v39  ;;  %v1750_v57 = vshrl.u32 %v2450_v46, %v1735_v13  ;;  %vm1754_vm7 = vcmp.lt.s32.totalorder %v3139_v30, 3 }
 0x30f   : > { %v2111_v17 = vmin.u32 %v1890_v22, %v3164_v10  ;;  %v1748_v62 = vor.u32 %v1747_v31, %v1746_v28  ;;  %vm1755_vm8 = vcmp.lt.s32.totalorder %v3139_v30, 4  ;;  %v1760_v33 = vsel %vm1752_vm5, %v1739_v63, %v1742_v36 }
 0x310   : > { %v1596_v25 = vxor.u32 2147483648, %v1595_v1  ;;  %v1751_v0 = vor.u32 %v1750_v57, %v1749_v59  ;;  %v1757_v26 = vsel %vm1755_vm8, %v1745_v56, 2102212464  ;;  %v1756_v40 = vsel %vm1752_vm5, %v1736_v43, %v1739_v63 }
 0x311   : > { %v1892_v11 = vclz %v2111_v17  ;;  %v1761_v35 = vsel %vm1755_vm8, %v1748_v62, 920167782  ;;  %v1764_v46 = vsel %vm1752_vm5, %v1742_v36, %v1745_v56  ;;  %v1758_v18 = vsel %vm1754_vm7, %v1742_v36, %v1757_v26 }
 0x312   : > { %v1597_v7 = vsel %vm1514_vm15, %v1596_v25, %v1595_v1  ;;  %v1762_v29 = vsel %vm1754_vm7, %v1745_v56, %v1761_v35  ;;  %v1765_v5 = vsel %vm1755_vm8, %v1751_v0, 1326507024  ;;  %v1759_v47 = vsel %vm1753_vm6, %v1756_v40, %v1758_v18 }
 0x313   : > { %v1600_v51 = vsel %vm3120_vm0, %v2959_v27, %v1597_v7  ;;  %v2112_v23 = vadd.s32 4294967294, %v1892_v11  ;;  %v1763_v38 = vsel %vm1753_vm6, %v1760_v33, %v1762_v29  ;;  %v1766_v42 = vsel %vm1754_vm7, %v1748_v62, %v1765_v5 }
 0x314   : > { %2421 = vcosq.f32 %v1600_v51  ;;  %v1767_v19 = vsel %vm1753_vm6, %v1764_v46, %v1766_v42  ;;  %v3198_v21 = vmul.u32.u64.low %v3147_v34, %v1763_v38  ;;  %v3199_v13 = vmul.u32.u64.high %v3147_v34, %v1763_v38, %v3198_v21 }
 0x315   : > { %v2418_v8 = vpop.eup %2417  ;;  %2423 = vsinq.f32 %v1600_v51  ;;  %vm2113_vm9 = vcmp.lt.s32.totalorder %v2112_v23, 0  ;;  %v3203_v49 = vmul.u32.u64.low %v3147_v34, %v1767_v19  ;;  %v3204_v54 = vmul.u32.u64.high %v3147_v34, %v1767_v19, %v3203_v49 }
 0x316   : > { %v2420_v14 = vpop.eup %2419  ;;  %v1895_v53 = vsel %vm2113_vm9, 0, %v2112_v23  ;;  %v1605_v15 = vadd.s32 3, %v1601_v32  ;;  %v1778_v50 = vadd.s32 1, %v3199_v13  ;;  %v1710_v4 = vand.u32 3, %v3149_v16 }
 0x317   : > { %v1900_v60 = vsub.s32 4294967266, %v1895_v53  ;;  %v1713_v52 = vxor.u32 2147483648, %v2420_v14  ;;  %v1716_v39 = vxor.u32 2147483648, %v2418_v8  ;;  %v1896_v37 = vsub.s32 32, %v1895_v53 }
 0x318   : > { %v1775_v55 = vmul.u32 %v3147_v34, %v1759_v47  ;;  %vm1777_vm10 = vc.u32 %v3204_v54, %v3198_v21  ;;  %v1880_v30 = vadd.s32 %v3109_v45, %v3115_v6  ;;  %vm1712_vm11 = vcmp.eq.s32.totalorder %v1710_v4, 0 }
 0x319   : > { %v1901_v63 = vadd.s32 127, %v1900_v60  ;;  %v1779_v58 = vsel %vm1777_vm10, %v1778_v50, %v3199_v13  ;;  %v1714_v36 = vsel %vm1712_vm11, %v2418_v8, %v1713_v52  ;;  %vm1715_vm12 = vcmp.eq.s32.totalorder %v1710_v4, 2 }
 0x31a   : > { %v1780_v32 = vadd.s32 %v1779_v58, %v1775_v55  ;;  %v1606_v16 = vand.u32 3, %v1605_v15  ;;  %vm1711_vm13 = vcmp.lt.s32.totalorder %v1710_v4, 2  ;;  %v1717_v41 = vsel %vm1715_vm12, %v1716_v39, %v2420_v14 }
 0x31b   : > { %v1902_v48 = vshll.u32 %v1901_v63, 23  ;;  %v1898_v22 = vshrl.u32 %v1880_v30, %v1896_v37  ;;  %vm1708_vm14 = vweird.f32 %v2957_v20  ;;  %v1718_v34 = vsel %vm1711_vm13, %v1714_v36, %v1717_v41 }
 0x31c   : > { %v1781_v43 = vadd.s32 536870912, %v1780_v32  ;;  %vm2452_vm15 = vmmov 0   ;;  %v1719_v45 = vsel %vm1708_vm14, nan, %v1718_v34  ;;  %v1897_v31 = vshll.u32 %v3164_v10, %v1895_v53 }
 0x31d   : > { %2257 = vmatprep.mubr.msk.bf16.mxu1 %vm2452_vm15, %v2451_v9  ;;  %v1903_v1 = vor.u32 4788187, %v1902_v48  ;;  %vm1611_vm0 = vcmp.eq.s32.totalorder %v1606_v16, 2  ;;  %vm1608_vm2 = vcmp.eq.s32.totalorder %v1606_v16, 0  ;;  %vm1607_vm3 = vcmp.lt.s32.totalorder %v1606_v16, 2 }
 0x31e   : > { %v2422_v28 = vpop.eup %2421  ;;  %v1782_v56 = vshrl.u32 %v1781_v43, 30  ;;  %v1899_v17 = vor.u32 %v1898_v22, %v1897_v31  ;;  %vm1604_vm4 = vweird.f32 %v2959_v27  ;;  %vm1826_vm6 = vcmp.lt.s32.totalorder %v2967_v3, 0 }
 0x31f   : > { %v2424_v6 = vpop.eup %2423  ;;  %v1612_v59 = vxor.u32 2147483648, %v2422_v28  ;;  %v1904_v0 = vand.u32 2147483647, %v1903_v1  ;;  %v1776_v23 = vadd.s32 %v3198_v21, %v3204_v54  ;;  %vm3232_vm7 = vcmp.le.f32.partialorder %v1824_v61, 0.7853982  ;;  %v1941_v61 = vpop.xlane.xlu0 %1940 }
 0x320   : > { %v1609_v57 = vxor.u32 2147483648, %v2424_v6  ;;  %v1783_v62 = vshll.u32 %v1782_v56, 30  ;;  %v1906_v40 = vcvt.s32.f32 %v1899_v17  ;;  %v1910_v47 = vsub.s32 4, %v3145_v24 }
 0x321   : > { %v1613_v25 = vsel %vm1611_vm0, %v1612_v59, %v2424_v6  ;;  %v1806_v4 = vsub.s32 4, %v1782_v56  ;;  %v1942_v52 = vadd.f32 1e-08, %v1941_v61  ;;  %vm1722_vm8 = vcmp.lt.s32.totalorder %v2973_v2, 0 }
 0x322   : > { %v1610_v20 = vsel %vm1608_vm2, %v2422_v28, %v1609_v57  ;;  %v1784_v26 = vsub.s32 %v1780_v32, %v1783_v62  ;;  %v1907_v46 = vmul.f32 %v1906_v40, %v1904_v0  ;;  %v1911_v15 = vsel %vm1826_vm6, %v1910_v47, %v3145_v24 }
 0x323   : > { %v1614_v33 = vsel %vm1607_vm3, %v1610_v20, %v1613_v25  ;;  %v1913_v39 = vsel %vm3232_vm7, 0, %v1911_v15  ;;  %vm1721_vm9 = vcmp.le.f32.partialorder %v1720_v44, 0.7853982  ;;  %v1807_v55 = vsel %vm1722_vm8, %v1806_v4, %v1782_v56 }
 0x324   : > { %v1615_v11 = vsel %vm1604_vm4, nan, %v1614_v33  ;;  %v1786_v35 = vsub.s32 0, %v1784_v26  ;;  %v1908_v29 = vxor.u32 2147483648, %v1907_v46  ;;  %v1917_v58 = vadd.s32 3, %v1913_v39 }
 0x325   : > { %v1946_v10 = vpack.c.bf16 %v1719_v45, %v1615_v11  ;;  %v1809_v32 = vsel %vm1721_vm9, 0, %v1807_v55  ;;  %vm1916_vm15 = vweird.f32 %v2967_v3  ;;  %vm1812_vm2 = vweird.f32 %v2973_v2 }
 0x326   : > { %v2107_v7 = vmin.u32 %v1786_v35, %v1784_v26  ;;  %v1909_v27 = vsel %vm1826_vm6, %v1908_v29, %v1907_v46  ;;  %v1918_v36 = vand.u32 3, %v1917_v58  ;;  %v1813_v16 = vadd.s32 3, %v1809_v32 }
 0x327   : > { %2254 = vmatpush3.bf16.msra.mxu1 %v1946_v10  ;;  %v1912_v49 = vsel %vm3232_vm7, %v2967_v3, %v1909_v27  ;;  %vm1991_vm3 = vcmask 518144  }
 0x328   : > { %2255 = vmatprep.subr.bf16.mxu1 %v2451_v9  ;;  %v1788_v18 = vclz %v2107_v7  ;;  %2425 = vcosq.f32 %v1912_v49  ;;  %vm1920_vm10 = vcmp.eq.s32.totalorder %v1918_v36, 0  ;;  %vm1923_vm11 = vcmp.eq.s32.totalorder %v1918_v36, 2 }
 0x329   : > { %2427 = vsinq.f32 %v1912_v49  ;;  %v1814_v43 = vand.u32 3, %v1813_v16  ;;  %vm1919_vm12 = vcmp.lt.s32.totalorder %v1918_v36, 2 }
 0x32a   : > { %v2108_v5 = vadd.s32 4294967294, %v1788_v18  ;;  %2429 = vrsqrt.f32 %v1942_v52 }
 0x32b   : > { %vm1819_vm13 = vcmp.eq.s32.totalorder %v1814_v43, 2  ;;  %vm1816_vm14 = vcmp.eq.s32.totalorder %v1814_v43, 0  ;;  %vm1815_vm0 = vcmp.lt.s32.totalorder %v1814_v43, 2 }
 0x32c   : > { %vm2109_vm5 = vcmp.lt.s32.totalorder %v2108_v5, 0 }
 0x32d   : > { %v1791_v51 = vsel %vm2109_vm5, 0, %v2108_v5 }
 0x32e   : > { %v1792_v38 = vsub.s32 32, %v1791_v51  ;;  %v1796_v42 = vsub.s32 4294967266, %v1791_v51  ;;  %v1793_v9 = vshll.u32 %v1784_v26, %v1791_v51 }
 0x330   : > { %v1794_v13 = vshrl.u32 %v1776_v23, %v1792_v38  ;;  %v1797_v8 = vadd.s32 127, %v1796_v42 }
 0x332   : > { %v1795_v14 = vor.u32 %v1794_v13, %v1793_v9  ;;  %v1798_v53 = vshll.u32 %v1797_v8, 23  ;;  %v2426_v48 = vpop.eup %2425 }
 0x333   : > { %v2428_v24 = vpop.eup %2427  ;;  %v1924_v22 = vxor.u32 2147483648, %v2426_v48 }
 0x334   : > { %v1799_v21 = vor.u32 4788187, %v1798_v53  ;;  %v1802_v60 = vcvt.s32.f32 %v1795_v14  ;;  %v1921_v41 = vxor.u32 2147483648, %v2428_v24  ;;  %v2430_v28 = vpop.eup %2429 }
 0x335   : > { %v1925_v44 = vsel %vm1923_vm11, %v1924_v22, %v2428_v24  ;;  %v1944_v57 = vmul.f32 %v2430_v28, %v2847_v12 }
 0x336   : > { %v1800_v54 = vand.u32 2147483647, %v1799_v21  ;;  %v1922_v34 = vsel %vm1920_vm10, %v2426_v48, %v1921_v41 }
 0x337   : > { %v1926_v1 = vsel %vm1919_vm12, %v1922_v34, %v1925_v44  ;;  %v1945_v26 = vpack.c.bf16 %v1944_v57, %v1944_v57 }
 0x338   : > { %v1803_v50 = vmul.f32 %v1802_v60, %v1800_v54  ;;  %v1927_v62 = vsel %vm1916_vm15, nan, %v1926_v1 }
 0x33a   : > { %v1804_v37 = vxor.u32 2147483648, %v1803_v50 }
 0x33c   : > { %v1805_v63 = vsel %vm1722_vm8, %v1804_v37, %v1803_v50 }
 0x33d   : > { %v1808_v30 = vsel %vm1721_vm9, %v2973_v2, %v1805_v63 }
 0x33e   : > { %2431 = vcosq.f32 %v1808_v30 }
 0x33f   : > { %2433 = vsinq.f32 %v1808_v30 }
 0x348   : > { %v2432_v45 = vpop.eup %2431 }
 0x349   : > { %v2434_v6 = vpop.eup %2433  ;;  %v1820_v31 = vxor.u32 2147483648, %v2432_v45 }
 0x34a   : > { %v1817_v56 = vxor.u32 2147483648, %v2434_v6 }
 0x34b   : > { %v1821_v59 = vsel %vm1819_vm13, %v1820_v31, %v2434_v6 }
 0x34c   : > { %v1818_v17 = vsel %vm1816_vm14, %v2432_v45, %v1817_v56 }
 0x34d   : > { %v1822_v25 = vsel %vm1815_vm0, %v1818_v17, %v1821_v59 }
 0x34e   : > { %v1823_v20 = vsel %vm1812_vm2, nan, %v1822_v25 }
 0x34f   : > { %v1947_v0 = vpack.c.bf16 %v1927_v62, %v1823_v20 }
 0x351   : > { %2256 = vmatpush3.bf16.msra.mxu1 %v1947_v0 }
 0x354   : > { %2258 = vmatmul.mubr.msk.bf16.vlgmr.msra.gmra.mrb[4].mxu1 %vm857_vm1, %v1945_v26 }
 0x427   : > { %v1985_v3 = vpop.f32.mrb[4].mxu1 }
 0x428   : > { %1992 = vst.msk [vmem:[%s315_s16] sm:$0x7] %vm1991_vm3, %v1985_v3  ;;  %v2259_v12 = vpop.f32.mrb[5].mxu1 }
 0x429   : > { %v1988_v33 = vpop.f32.mrb[6].mxu1 }
 0x42a   : > { %v2260_v11 = vpop.f32.mrb[7].mxu1 }
 0x42b PF: > { %s17_s24 = sadd.s32 1, %s2441_s24  }
 0x42c   : > { %p14_p4 = scmp.ge.s32.totalorder %s17_s24, 4  }
 0x42e   :  { %16 = sbr.rel (!%p14_p4) target bundleno = 1 (0x1), region = 87 }

</bundles_post_ra>
